<compile_context>
chip_gen: v5e
topology: v5e:2x2
jax: 0.10.0
libtpu: 0.0.40
codegen_flags: <defaults>
</compile_context>

<pallas_src>
import functools

import jax
import jax.numpy as jnp
from jax.experimental import pallas as pl
from jax.experimental.pallas import tpu as pltpu


# ---------------------------------------------------------------------------
# Helpers
# ---------------------------------------------------------------------------

def _round_up(a, b):
    return ((a + b - 1) // b) * b


def _pick_conv_row_tile(OH, OW, G, Kg, Cout, budget_bytes=5 << 20):
    """Largest divisor of OH whose double-buffered (taps + y) blocks + f32 acc fit
    budget_bytes; row count TH*OW must be sublane aligned (mult of 8) unless full."""
    Kp = _round_up(Kg, 128)
    Cp = _round_up(Cout, 128)

    def cost(d):
        rows = d * OW
        tap = G * rows * Kp * 2     # bf16 tap block (lane padded)
        y = rows * Cp * 2           # bf16 conv-output block
        acc = rows * Cp * 4         # f32 accumulator intermediate
        return 2 * (tap + y) + acc  # double-buffered in/out + acc

    chosen = OH
    for d in range(OH, 0, -1):
        if OH % d:
            continue
        if d != OH and (d * OW) % 8 != 0:
            continue
        chosen = d
        if cost(d) <= budget_bytes:
            return d
    return chosen                   # smallest aligned divisor as fallback


def _bn_row_tile(R, L, itemsize, budget_bytes=4 << 20):
    """Row tile for the lane-dense BN apply pass (~budget_bytes per input block)."""
    if R <= 8:
        return R
    budget_rows = max(8, (budget_bytes // (L * itemsize)) // 8 * 8)
    return int(min(budget_rows, (R // 8) * 8))


# ---------------------------------------------------------------------------
# Kernel 1: 3x3/stride-2 conv (G accumulated MXU matmuls) + BN partial statistics
#   taps_ref: (1, G, TH*OW, Kg) bf16   row-blocked tap slabs (G=1 full im2col, or
#                                      G=3 per-kh slabs with kw folded into K)
#   w_ref:    (G, Kg, Cout)     bf16
#   y_ref:    (1, TH*OW, Cout)  bf16   conv output rows for this (batch, row tile)
#   sum/m2:   (1, 1, 1, Cout)   f32    per-tile sum and centered sum-of-squares
# ---------------------------------------------------------------------------

def _conv3x3_s2_kernel(taps_ref, w_ref, y_ref, sum_ref, m2_ref, *, G, rows):
    acc = jnp.dot(taps_ref[0, 0], w_ref[0], preferred_element_type=jnp.float32)
    for g in range(1, G):
        acc = acc + jnp.dot(taps_ref[0, g], w_ref[g],
                            preferred_element_type=jnp.float32)

    y_ref[...] = acc[None].astype(y_ref.dtype)

    s = jnp.sum(acc, axis=0, keepdims=True)            # (1, Cout)
    cent = acc - s * (1.0 / rows)                      # centered within the tile
    sum_ref[...] = s[None, None]
    m2_ref[...] = jnp.sum(cent * cent, axis=0, keepdims=True)[None, None]


def pallas_conv3x3_s2(taps, wk, OH, OW):
    """taps: (B, G, OH*OW, Kg) bf16, wk: (G, Kg, Cout) bf16.
    Returns conv output y: (B, OH*OW, Cout) plus per-(batch, row-tile) sum / M2."""
    B, G, _, Kg = taps.shape
    Cout = wk.shape[-1]
    TH = _pick_conv_row_tile(OH, OW, G, Kg, Cout)
    nt = OH // TH
    rows = TH * OW

    kernel = functools.partial(_conv3x3_s2_kernel, G=G, rows=rows)
    y_shape = jax.ShapeDtypeStruct((B, OH * OW, Cout), taps.dtype)
    s_shape = jax.ShapeDtypeStruct((B, nt, 1, Cout), jnp.float32)

    return pl.pallas_call(
        kernel,
        out_shape=(y_shape, s_shape, s_shape),
        grid_spec=pltpu.PrefetchScalarGridSpec(
            num_scalar_prefetch=0,
            grid=(B, nt),
            in_specs=[
                # taps blocked along the row axis: only TH output rows per step
                pl.BlockSpec((1, G, rows, Kg), lambda b, t: (b, 0, t, 0)),
                pl.BlockSpec((G, Kg, Cout), lambda b, t: (0, 0, 0)),
            ],
            out_specs=(
                pl.BlockSpec((1, rows, Cout), lambda b, t: (b, t, 0)),
                pl.BlockSpec((1, 1, 1, Cout), lambda b, t: (b, t, 0, 0)),
                pl.BlockSpec((1, 1, 1, Cout), lambda b, t: (b, t, 0, 0)),
            ),
        ),
        compiler_params=pltpu.CompilerParams(
            dimension_semantics=("parallel", "parallel"),
            vmem_limit_bytes=32 * 1024 * 1024,
        ),
    )(taps, wk)


# ---------------------------------------------------------------------------
# Kernel 2: tiled, lane-dense BatchNorm apply + ReLU (layers 1..3)
# ---------------------------------------------------------------------------

def _bn_relu_kernel(y_ref, sc_ref, sh_ref, o_ref):
    y = y_ref[...].astype(jnp.float32)
    o_ref[...] = jnp.maximum(y * sc_ref[...] + sh_ref[...], 0.0).astype(o_ref.dtype)


def pallas_bn_relu_apply(y2, scale_row, shift_row):
    """y2: (R, L) with L = OW*Cout (lane-dense), scale/shift: (1, L) f32."""
    R, L = y2.shape
    TR = _bn_row_tile(R, L, jnp.dtype(y2.dtype).itemsize)
    return pl.pallas_call(
        _bn_relu_kernel,
        out_shape=jax.ShapeDtypeStruct((R, L), y2.dtype),
        grid_spec=pltpu.PrefetchScalarGridSpec(
            num_scalar_prefetch=0,
            grid=(pl.cdiv(R, TR),),
            in_specs=[
                pl.BlockSpec((TR, L), lambda i: (i, 0)),
                pl.BlockSpec((1, L), lambda i: (0, 0)),
                pl.BlockSpec((1, L), lambda i: (0, 0)),
            ],
            out_specs=pl.BlockSpec((TR, L), lambda i: (i, 0)),
        ),
        compiler_params=pltpu.CompilerParams(
            dimension_semantics=("parallel",),
            vmem_limit_bytes=32 * 1024 * 1024,
        ),
    )(y2, scale_row, shift_row)


# ---------------------------------------------------------------------------
# Kernel 3: fused (BN scale/shift + ReLU) -> K-tiled matmul + bias (1x1 projection)
# ---------------------------------------------------------------------------

def _bn_relu_matmul_bias_kernel(x_ref, sc_ref, sh_ref, w_ref, b_ref, o_ref, acc_ref):
    k = pl.program_id(1)

    @pl.when(k == 0)
    def _():
        acc_ref[...] = jnp.zeros_like(acc_ref)

    x = x_ref[...].astype(jnp.float32)
    xn = jnp.maximum(x * sc_ref[...] + sh_ref[...], 0.0).astype(w_ref.dtype)
    acc_ref[...] += jnp.dot(xn, w_ref[...], preferred_element_type=jnp.float32)

    @pl.when(k == pl.num_programs(1) - 1)
    def _():
        o_ref[...] = (acc_ref[...] + b_ref[...]).astype(o_ref.dtype)


def pallas_bn_relu_matmul_bias(x, scale, shift, w, b):
    """x: (M, K) bf16 pre-BN conv output, scale/shift: (1, K) f32,
    w: (K, N) bf16, b: (1, N) f32 -> (M, N) f32."""
    M, K = x.shape
    N = w.shape[1]
    TM = 512 if M >= 512 else M
    if K > 512:
        TK = next((c for c in (512, 256, 128) if K % c == 0), K)
    else:
        TK = K
    grid = (pl.cdiv(M, TM), K // TK)   # ragged last M block handled by Pallas masking

    return pl.pallas_call(
        _bn_relu_matmul_bias_kernel,
        out_shape=jax.ShapeDtypeStruct((M, N), jnp.float32),
        grid_spec=pltpu.PrefetchScalarGridSpec(
            num_scalar_prefetch=0,
            grid=grid,
            in_specs=[
                pl.BlockSpec((TM, TK), lambda i, k: (i, k)),
                pl.BlockSpec((1, TK), lambda i, k: (0, k)),
                pl.BlockSpec((1, TK), lambda i, k: (0, k)),
                pl.BlockSpec((TK, N), lambda i, k: (k, 0)),
                pl.BlockSpec((1, N), lambda i, k: (0, 0)),
            ],
            out_specs=pl.BlockSpec((TM, N), lambda i, k: (i, 0)),
            scratch_shapes=[pltpu.VMEM((TM, N), jnp.float32)],
        ),
        compiler_params=pltpu.CompilerParams(
            dimension_semantics=("parallel", "arbitrary"),
            vmem_limit_bytes=32 * 1024 * 1024,
        ),
    )(x, scale, shift, w, b)


# ---------------------------------------------------------------------------
# Tap construction (wrapper-side strided slicing; all block-aligned for the kernel)
# ---------------------------------------------------------------------------

def _im2col_taps(x, OH, OW):
    """Full im2col (tiny Cin): taps[b,0,oh*OW+ow,(kh*3+kw)*Cin+ci] = xpad[b,2oh+kh,2ow+kw,ci]."""
    B, _, _, Cin = x.shape
    xpad = jnp.pad(x, ((0, 0), (1, 1), (1, 1), (0, 0)))
    slabs = [xpad[:, kh:kh + 2 * OH:2, kw:kw + 2 * OW:2, :]
             for kh in range(3) for kw in range(3)]
    taps = jnp.concatenate(slabs, axis=-1)                       # (B, OH, OW, 9*Cin)
    return taps.reshape(B, 1, OH * OW, 9 * Cin)


def _perkh_taps(x, OH, OW):
    """Per-kh slabs with kw folded into K: taps[b,kh,oh*OW+ow,kw*Cin+ci]."""
    B, _, _, Cin = x.shape
    xpad = jnp.pad(x, ((0, 0), (1, 1), (1, 1), (0, 0)))
    per_kh = []
    for kh in range(3):
        rows = xpad[:, kh:kh + 2 * OH:2, :, :]                   # (B, OH, W+2, Cin)
        cols = jnp.concatenate(
            [rows[:, :, kw:kw + 2 * OW:2, :] for kw in range(3)], axis=-1)
        per_kh.append(cols)                                      # (B, OH, OW, 3*Cin)
    return jnp.stack(per_kh, axis=1).reshape(B, 3, OH * OW, 3 * Cin)


def _conv3x3_s2_stats(x, w):
    """x: (B,H,W,Cin) NHWC bf16, w: (3,3,Cin,Cout) HWIO bf16. stride=2, pad=1, no bias.
    Returns y: (B, OH*OW, Cout) bf16 plus batch mean/var (Cout,) f32 (biased var)."""
    B, H, W, Cin = x.shape
    Cout = w.shape[-1]
    OH, OW = H // 2, W // 2

    if Cin * 9 <= 128:
        taps = _im2col_taps(x, OH, OW)                            # (B, 1, OH*OW, 9*Cin)
        wk = w.reshape(9 * Cin, Cout)[None]                       # (1, 9*Cin, Cout)
    else:
        taps = _perkh_taps(x, OH, OW)                             # (B, 3, OH*OW, 3*Cin)
        wk = w.reshape(3, 3 * Cin, Cout)                          # (3, 3*Cin, Cout)

    y, ssum, m2 = pallas_conv3x3_s2(taps, wk, OH, OW)

    # Merge per-tile (sum, centered M2) partials -> global mean / biased variance
    # (Chan's parallel formula; avoids E[x^2]-E[x]^2 cancellation).
    nt = ssum.shape[1]
    cnt = (OH // nt) * OW
    n = B * OH * OW
    mean = jnp.sum(ssum, axis=(0, 1, 2)) / n
    tmean = ssum[:, :, 0, :] / cnt                                # (B, nt, Cout)
    between = cnt * jnp.sum((tmean - mean) ** 2, axis=(0, 1))
    var = jnp.maximum((jnp.sum(m2, axis=(0, 1, 2)) + between) / n, 0.0)
    return y, mean, var, OH, OW, Cout


# ---------------------------------------------------------------------------
# ConvStem forward (JAX glue + kernels)
# ---------------------------------------------------------------------------

def conv_stem_forward(x_nchw, params, img_size, embed_dim,
                      compute_dtype=jnp.bfloat16):
    B, C, H, W = x_nchw.shape
    assert img_size % 16 == 0, "ConvStem only supports patch size of 16"
    assert H == img_size and W == img_size, "input image size mismatch"

    x = jnp.transpose(x_nchw, (0, 2, 3, 1)).astype(compute_dtype)     # NCHW -> NHWC
    n_stem = len(params["stem"])
    xm = last_scale = last_shift = None
    OH = OW = None

    for li, (w, gamma, beta) in enumerate(params["stem"]):
        gamma = gamma.reshape(-1).astype(jnp.float32)
        beta = beta.reshape(-1).astype(jnp.float32)
        y, mean, var, OH, OW, Cout = _conv3x3_s2_stats(x, w.astype(compute_dtype))
        inv = jax.lax.rsqrt(var + 1e-5)
        scale = gamma * inv
        shift = beta - mean * scale

        if li < n_stem - 1:
            # Lane-dense BN apply: view y as (B*OH, OW*Cout) (free row-major reshape).
            scale_row = jnp.tile(scale, OW).reshape(1, OW * Cout)
            shift_row = jnp.tile(shift, OW).reshape(1, OW * Cout)
            y2 = y.reshape(B * OH, OW * Cout)
            x = pallas_bn_relu_apply(y2, scale_row, shift_row).reshape(B, OH, OW, Cout)
        else:
            # Last stem layer: BN + ReLU fused into the projection matmul.
            xm = y.reshape(B * OH * OW, Cout)
            last_scale = scale.reshape(1, -1)
            last_shift = shift.reshape(1, -1)

    w_proj, b_proj = params["proj"]                                   # 1x1 conv + bias
    out = pallas_bn_relu_matmul_bias(
        xm, last_scale, last_shift,
        w_proj.astype(compute_dtype),
        b_proj.reshape(1, -1).astype(jnp.float32))
    out = out.reshape(B, OH * OW, embed_dim)                          # flatten(2).transpose(1,2)
    # self.norm = nn.Identity()  (norm_layer=None)
    return out
    # TODO(synk): BatchNorm running_mean/running_var buffer updates (a training-mode
    # side effect, not part of the returned value) are not reproduced.


# ---------------------------------------------------------------------------
# Deterministic parameter init (shapes follow ConvStem.__init__)
# ---------------------------------------------------------------------------

def init_params(key, embed_dim):
    params = {"stem": [], "proj": None}
    cin, cout = 3, embed_dim // 8
    for _ in range(4):
        key, k1, k2, k3 = jax.random.split(key, 4)
        w = 0.1 * jax.random.normal(k1, (3, 3, cin, cout), jnp.float32)       # HWIO
        gamma = 1.0 + 0.1 * jax.random.normal(k2, (1, cout), jnp.float32)
        beta = 0.1 * jax.random.normal(k3, (1, cout), jnp.float32)
        params["stem"].append((w, gamma, beta))
        cin, cout = cout, cout * 2
    key, k1, k2 = jax.random.split(key, 3)
    w_proj = 0.1 * jax.random.normal(k1, (cin, embed_dim), jnp.float32)        # 1x1 conv
    b_proj = 0.1 * jax.random.normal(k2, (1, embed_dim), jnp.float32)
    params["proj"] = (w_proj, b_proj)
    return params


# ---------------------------------------------------------------------------
# Pure-JAX reference (mirrors the bf16 MXU inputs / bf16 activation storage so the
# comparison only measures kernel correctness, not dtype policy)
# ---------------------------------------------------------------------------

def reference_forward(x_nchw, params, embed_dim, compute_dtype=jnp.bfloat16):
    x = jnp.transpose(x_nchw, (0, 2, 3, 1)).astype(compute_dtype)
    for (w, gamma, beta) in params["stem"]:
        y = jax.lax.conv_general_dilated(
            x.astype(compute_dtype), w.astype(compute_dtype),
            window_strides=(2, 2), padding=((1, 1), (1, 1)),
            dimension_numbers=("NHWC", "HWIO", "NHWC"),
            preferred_element_type=jnp.float32)
        mean = jnp.mean(y, axis=(0, 1, 2), keepdims=True)
        var = jnp.mean((y - mean) ** 2, axis=(0, 1, 2), keepdims=True)
        yb = y.astype(compute_dtype).astype(jnp.float32)     # mirror bf16 storage of pre-BN y
        yn = (yb - mean) * jax.lax.rsqrt(var + 1e-5) * gamma.reshape(1, 1, 1, -1) \
            + beta.reshape(1, 1, 1, -1)
        x = jnp.maximum(yn, 0.0).astype(compute_dtype)
    w_proj, b_proj = params["proj"]
    B, OH, OW, C = x.shape
    ym = jnp.dot(x.reshape(B * OH * OW, C).astype(compute_dtype),
                 w_proj.astype(compute_dtype),
                 preferred_element_type=jnp.float32) + b_proj.astype(jnp.float32)
    return ym.reshape(B, OH * OW, embed_dim)


# ---------------------------------------------------------------------------

if __name__ == "__main__":
    IMG_SIZE = 32        # small but divisible by patch_size=16 (grid 2x2 -> 4 patches)
    EMBED_DIM = 64       # divisible by 8 (stem channels: 8 -> 16 -> 32 -> 64)
    BATCH = 2

    key = jax.random.PRNGKey(0)
    key, kx = jax.random.split(key)
    x = jax.random.normal(kx, (BATCH, 3, IMG_SIZE, IMG_SIZE), jnp.float32)  # NCHW
    params = init_params(key, EMBED_DIM)

    fwd = jax.jit(functools.partial(conv_stem_forward,
                                    img_size=IMG_SIZE, embed_dim=EMBED_DIM))
    out = jax.block_until_ready(fwd(x, params))

    expected_patches = (IMG_SIZE // 16) ** 2
    assert out.shape == (BATCH, expected_patches, EMBED_DIM), out.shape

    ref = jax.block_until_ready(reference_forward(x, params, EMBED_DIM))
    max_err = jnp.max(jnp.abs(out - ref))
    assert jnp.allclose(out, ref, rtol=1e-2, atol=1e-2), f"max abs err {max_err}"

    print("KERNEL_OK")
</pallas_src>

<mosaic_0001>
module attributes {stable_mosaic.version = 11 : i64} {
  func.func @_conv3x3_s2_kernel(%arg0: i32, %arg1: i32, %arg2: memref<1x1x256x27xbf16, #tpu.memory_space<vmem>>, %arg3: memref<1x27x8xbf16, #tpu.memory_space<vmem>>, %arg4: memref<1x256x8xbf16, #tpu.memory_space<vmem>>, %arg5: memref<1x1x1x8xf32, #tpu.memory_space<vmem>>, %arg6: memref<1x1x1x8xf32, #tpu.memory_space<vmem>>) attributes {dimension_semantics = [#tpu.dimension_semantics<parallel>, #tpu.dimension_semantics<parallel>], iteration_bounds = array<i64: 2, 1>, scalar_prefetch = 0 : i64, scratch_operands = 0 : i64, tpu.core_type = #tpu.core_type<tc>, window_params = [{transform_indices = @transform_0, window_bounds = array<i64: 1, 1, 256, 27>}, {pipeline_mode = #tpu.pipeline_mode<synchronous>, transform_indices = @transform_1, window_bounds = array<i64: 1, 27, 8>}, {transform_indices = @transform_2, window_bounds = array<i64: 1, 256, 8>}, {transform_indices = @transform_3, window_bounds = array<i64: 1, 1, 1, 8>}, {transform_indices = @transform_4, window_bounds = array<i64: 1, 1, 1, 8>}]} {
    %c0 = arith.constant 0 : index
    %c0_0 = arith.constant 0 : index
    %c0_1 = arith.constant 0 : index
    %c0_2 = arith.constant 0 : index
    %0 = vector.load %arg2[%c0, %c0_0, %c0_1, %c0_2] : memref<1x1x256x27xbf16, #tpu.memory_space<vmem>>, vector<1x1x256x27xbf16>
    %1 = vector.shape_cast %0 : vector<1x1x256x27xbf16> to vector<256x27xbf16>
    %c0_3 = arith.constant 0 : index
    %c0_4 = arith.constant 0 : index
    %c0_5 = arith.constant 0 : index
    %2 = vector.load %arg3[%c0_3, %c0_4, %c0_5] : memref<1x27x8xbf16, #tpu.memory_space<vmem>>, vector<1x27x8xbf16>
    %3 = vector.shape_cast %2 : vector<1x27x8xbf16> to vector<27x8xbf16>
    %cst = arith.constant dense<0.000000e+00> : vector<256x8xf32>
    %4 = tpu.matmul %1, %3, %cst {dimension_numbers = #tpu.dot_dimension_numbers<[1], [0], [0], [1], [0, 0, 1, 1], [], []>} : vector<256x27xbf16>, vector<27x8xbf16>, vector<256x8xf32> -> vector<256x8xf32>
    %5 = vector.shape_cast %4 : vector<256x8xf32> to vector<1x256x8xf32>
    %6 = arith.truncf %5 : vector<1x256x8xf32> to vector<1x256x8xbf16>
    %c0_6 = arith.constant 0 : index
    %c0_7 = arith.constant 0 : index
    %c0_8 = arith.constant 0 : index
    %7 = vector.load %arg4[%c0_6, %c0_7, %c0_8] : memref<1x256x8xbf16, #tpu.memory_space<vmem>>, vector<1x256x8xbf16>
    tpu.vector_store %arg4[%c0_6, %c0_7, %c0_8], %6 {strides = array<i32>} : memref<1x256x8xbf16, #tpu.memory_space<vmem>>, vector<1x256x8xbf16>,
    %cst_9 = arith.constant dense<0.000000e+00> : vector<8xf32>
    %8 = vector.multi_reduction <add>, %4, %cst_9 [0] : vector<256x8xf32> to vector<8xf32>
    %9 = vector.shape_cast %8 : vector<8xf32> to vector<1x8xf32>
    %cst_10 = arith.constant 3.906250e-03 : f32
    %10 = vector.broadcast %cst_10 : f32 to vector<1x8xf32>
    %11 = arith.mulf %9, %10 : vector<1x8xf32>
    %12 = vector.broadcast %11 : vector<1x8xf32> to vector<256x8xf32>
    %13 = arith.subf %4, %12 : vector<256x8xf32>
    %14 = vector.shape_cast %9 : vector<1x8xf32> to vector<1x1x1x8xf32>
    %c0_11 = arith.constant 0 : index
    %c0_12 = arith.constant 0 : index
    %c0_13 = arith.constant 0 : index
    %c0_14 = arith.constant 0 : index
    %15 = vector.load %arg5[%c0_11, %c0_12, %c0_13, %c0_14] : memref<1x1x1x8xf32, #tpu.memory_space<vmem>>, vector<1x1x1x8xf32>
    tpu.vector_store %arg5[%c0_11, %c0_12, %c0_13, %c0_14], %14 {strides = array<i32>} : memref<1x1x1x8xf32, #tpu.memory_space<vmem>>, vector<1x1x1x8xf32>,
    %16 = arith.mulf %13, %13 : vector<256x8xf32>
    %cst_15 = arith.constant dense<0.000000e+00> : vector<8xf32>
    %17 = vector.multi_reduction <add>, %16, %cst_15 [0] : vector<256x8xf32> to vector<8xf32>
    %18 = vector.shape_cast %17 : vector<8xf32> to vector<1x8xf32>
    %19 = vector.shape_cast %18 : vector<1x8xf32> to vector<1x1x1x8xf32>
    %c0_16 = arith.constant 0 : index
    %c0_17 = arith.constant 0 : index
    %c0_18 = arith.constant 0 : index
    %c0_19 = arith.constant 0 : index
    %20 = vector.load %arg6[%c0_16, %c0_17, %c0_18, %c0_19] : memref<1x1x1x8xf32, #tpu.memory_space<vmem>>, vector<1x1x1x8xf32>
    tpu.vector_store %arg6[%c0_16, %c0_17, %c0_18, %c0_19], %19 {strides = array<i32>} : memref<1x1x1x8xf32, #tpu.memory_space<vmem>>, vector<1x1x1x8xf32>,
    return
  }
  func.func @transform_0(%arg0: i32, %arg1: i32) -> (i32, i32, i32, i32) {
    %c0_i32 = arith.constant 0 : i32
    %c0_i32_0 = arith.constant 0 : i32
    %c0_i32_1 = arith.constant 0 : i32
    return %arg0, %c0_i32, %arg1, %c0_i32_0 : i32, i32, i32, i32
  }
  func.func @transform_1(%arg0: i32, %arg1: i32) -> (i32, i32, i32) {
    %c0_i32 = arith.constant 0 : i32
    %c0_i32_0 = arith.constant 0 : i32
    %c0_i32_1 = arith.constant 0 : i32
    %c0_i32_2 = arith.constant 0 : i32
    return %c0_i32, %c0_i32_0, %c0_i32_1 : i32, i32, i32
  }
  func.func @transform_2(%arg0: i32, %arg1: i32) -> (i32, i32, i32) {
    %c0_i32 = arith.constant 0 : i32
    %c0_i32_0 = arith.constant 0 : i32
    return %arg0, %arg1, %c0_i32 : i32, i32, i32
  }
  func.func @transform_3(%arg0: i32, %arg1: i32) -> (i32, i32, i32, i32) {
    %c0_i32 = arith.constant 0 : i32
    %c0_i32_0 = arith.constant 0 : i32
    %c0_i32_1 = arith.constant 0 : i32
    return %arg0, %arg1, %c0_i32, %c0_i32_0 : i32, i32, i32, i32
  }
  func.func @transform_4(%arg0: i32, %arg1: i32) -> (i32, i32, i32, i32) {
    %c0_i32 = arith.constant 0 : i32
    %c0_i32_0 = arith.constant 0 : i32
    %c0_i32_1 = arith.constant 0 : i32
    return %arg0, %arg1, %c0_i32, %c0_i32_0 : i32, i32, i32, i32
  }
}

module attributes {stable_mosaic.version = 11 : i64} {
  func.func @_bn_relu_kernel(%arg0: i32, %arg1: memref<32x128xbf16, #tpu.memory_space<vmem>>, %arg2: memref<1x128xf32, #tpu.memory_space<vmem>>, %arg3: memref<1x128xf32, #tpu.memory_space<vmem>>, %arg4: memref<32x128xbf16, #tpu.memory_space<vmem>>) attributes {dimension_semantics = [#tpu.dimension_semantics<parallel>], iteration_bounds = array<i64: 1>, scalar_prefetch = 0 : i64, scratch_operands = 0 : i64, tpu.core_type = #tpu.core_type<tc>, window_params = [{transform_indices = @transform_0, window_bounds = array<i64: 32, 128>}, {pipeline_mode = #tpu.pipeline_mode<synchronous>, transform_indices = @transform_1, window_bounds = array<i64: 1, 128>}, {pipeline_mode = #tpu.pipeline_mode<synchronous>, transform_indices = @transform_2, window_bounds = array<i64: 1, 128>}, {transform_indices = @transform_3, window_bounds = array<i64: 32, 128>}]} {
    %c0 = arith.constant 0 : index
    %c0_0 = arith.constant 0 : index
    %0 = vector.load %arg1[%c0, %c0_0] : memref<32x128xbf16, #tpu.memory_space<vmem>>, vector<32x128xbf16>
    %1 = arith.extf %0 : vector<32x128xbf16> to vector<32x128xf32>
    %c0_1 = arith.constant 0 : index
    %c0_2 = arith.constant 0 : index
    %2 = vector.load %arg2[%c0_1, %c0_2] : memref<1x128xf32, #tpu.memory_space<vmem>>, vector<1x128xf32>
    %3 = vector.broadcast %2 : vector<1x128xf32> to vector<32x128xf32>
    %4 = arith.mulf %1, %3 : vector<32x128xf32>
    %c0_3 = arith.constant 0 : index
    %c0_4 = arith.constant 0 : index
    %5 = vector.load %arg3[%c0_3, %c0_4] : memref<1x128xf32, #tpu.memory_space<vmem>>, vector<1x128xf32>
    %6 = vector.broadcast %5 : vector<1x128xf32> to vector<32x128xf32>
    %7 = arith.addf %4, %6 : vector<32x128xf32>
    %cst = arith.constant 0.000000e+00 : f32
    %8 = vector.broadcast %cst : f32 to vector<32x128xf32>
    %9 = arith.maximumf %7, %8 : vector<32x128xf32>
    %10 = arith.truncf %9 : vector<32x128xf32> to vector<32x128xbf16>
    %c0_5 = arith.constant 0 : index
    %c0_6 = arith.constant 0 : index
    %11 = vector.load %arg4[%c0_5, %c0_6] : memref<32x128xbf16, #tpu.memory_space<vmem>>, vector<32x128xbf16>
    tpu.vector_store %arg4[%c0_5, %c0_6], %10 {strides = array<i32>} : memref<32x128xbf16, #tpu.memory_space<vmem>>, vector<32x128xbf16>,
    return
  }
  func.func @transform_0(%arg0: i32) -> (i32, i32) {
    %c0_i32 = arith.constant 0 : i32
    %c0_i32_0 = arith.constant 0 : i32
    return %arg0, %c0_i32 : i32, i32
  }
  func.func @transform_1(%arg0: i32) -> (i32, i32) {
    %c0_i32 = arith.constant 0 : i32
    %c0_i32_0 = arith.constant 0 : i32
    %c0_i32_1 = arith.constant 0 : i32
    return %c0_i32, %c0_i32_0 : i32, i32
  }
  func.func @transform_2(%arg0: i32) -> (i32, i32) {
    %c0_i32 = arith.constant 0 : i32
    %c0_i32_0 = arith.constant 0 : i32
    %c0_i32_1 = arith.constant 0 : i32
    return %c0_i32, %c0_i32_0 : i32, i32
  }
  func.func @transform_3(%arg0: i32) -> (i32, i32) {
    %c0_i32 = arith.constant 0 : i32
    %c0_i32_0 = arith.constant 0 : i32
    return %arg0, %c0_i32 : i32, i32
  }
}

module attributes {stable_mosaic.version = 11 : i64} {
  func.func @_conv3x3_s2_kernel(%arg0: i32, %arg1: i32, %arg2: memref<1x1x64x72xbf16, #tpu.memory_space<vmem>>, %arg3: memref<1x72x16xbf16, #tpu.memory_space<vmem>>, %arg4: memref<1x64x16xbf16, #tpu.memory_space<vmem>>, %arg5: memref<1x1x1x16xf32, #tpu.memory_space<vmem>>, %arg6: memref<1x1x1x16xf32, #tpu.memory_space<vmem>>) attributes {dimension_semantics = [#tpu.dimension_semantics<parallel>, #tpu.dimension_semantics<parallel>], iteration_bounds = array<i64: 2, 1>, scalar_prefetch = 0 : i64, scratch_operands = 0 : i64, tpu.core_type = #tpu.core_type<tc>, window_params = [{transform_indices = @transform_0, window_bounds = array<i64: 1, 1, 64, 72>}, {pipeline_mode = #tpu.pipeline_mode<synchronous>, transform_indices = @transform_1, window_bounds = array<i64: 1, 72, 16>}, {transform_indices = @transform_2, window_bounds = array<i64: 1, 64, 16>}, {transform_indices = @transform_3, window_bounds = array<i64: 1, 1, 1, 16>}, {transform_indices = @transform_4, window_bounds = array<i64: 1, 1, 1, 16>}]} {
    %c0 = arith.constant 0 : index
    %c0_0 = arith.constant 0 : index
    %c0_1 = arith.constant 0 : index
    %c0_2 = arith.constant 0 : index
    %0 = vector.load %arg2[%c0, %c0_0, %c0_1, %c0_2] : memref<1x1x64x72xbf16, #tpu.memory_space<vmem>>, vector<1x1x64x72xbf16>
    %1 = vector.shape_cast %0 : vector<1x1x64x72xbf16> to vector<64x72xbf16>
    %c0_3 = arith.constant 0 : index
    %c0_4 = arith.constant 0 : index
    %c0_5 = arith.constant 0 : index
    %2 = vector.load %arg3[%c0_3, %c0_4, %c0_5] : memref<1x72x16xbf16, #tpu.memory_space<vmem>>, vector<1x72x16xbf16>
    %3 = vector.shape_cast %2 : vector<1x72x16xbf16> to vector<72x16xbf16>
    %cst = arith.constant dense<0.000000e+00> : vector<64x16xf32>
    %4 = tpu.matmul %1, %3, %cst {dimension_numbers = #tpu.dot_dimension_numbers<[1], [0], [0], [1], [0, 0, 1, 1], [], []>} : vector<64x72xbf16>, vector<72x16xbf16>, vector<64x16xf32> -> vector<64x16xf32>
    %5 = vector.shape_cast %4 : vector<64x16xf32> to vector<1x64x16xf32>
    %6 = arith.truncf %5 : vector<1x64x16xf32> to vector<1x64x16xbf16>
    %c0_6 = arith.constant 0 : index
    %c0_7 = arith.constant 0 : index
    %c0_8 = arith.constant 0 : index
    %7 = vector.load %arg4[%c0_6, %c0_7, %c0_8] : memref<1x64x16xbf16, #tpu.memory_space<vmem>>, vector<1x64x16xbf16>
    tpu.vector_store %arg4[%c0_6, %c0_7, %c0_8], %6 {strides = array<i32>} : memref<1x64x16xbf16, #tpu.memory_space<vmem>>, vector<1x64x16xbf16>,
    %cst_9 = arith.constant dense<0.000000e+00> : vector<16xf32>
    %8 = vector.multi_reduction <add>, %4, %cst_9 [0] : vector<64x16xf32> to vector<16xf32>
    %9 = vector.shape_cast %8 : vector<16xf32> to vector<1x16xf32>
    %cst_10 = arith.constant 1.562500e-02 : f32
    %10 = vector.broadcast %cst_10 : f32 to vector<1x16xf32>
    %11 = arith.mulf %9, %10 : vector<1x16xf32>
    %12 = vector.broadcast %11 : vector<1x16xf32> to vector<64x16xf32>
    %13 = arith.subf %4, %12 : vector<64x16xf32>
    %14 = vector.shape_cast %9 : vector<1x16xf32> to vector<1x1x1x16xf32>
    %c0_11 = arith.constant 0 : index
    %c0_12 = arith.constant 0 : index
    %c0_13 = arith.constant 0 : index
    %c0_14 = arith.constant 0 : index
    %15 = vector.load %arg5[%c0_11, %c0_12, %c0_13, %c0_14] : memref<1x1x1x16xf32, #tpu.memory_space<vmem>>, vector<1x1x1x16xf32>
    tpu.vector_store %arg5[%c0_11, %c0_12, %c0_13, %c0_14], %14 {strides = array<i32>} : memref<1x1x1x16xf32, #tpu.memory_space<vmem>>, vector<1x1x1x16xf32>,
    %16 = arith.mulf %13, %13 : vector<64x16xf32>
    %cst_15 = arith.constant dense<0.000000e+00> : vector<16xf32>
    %17 = vector.multi_reduction <add>, %16, %cst_15 [0] : vector<64x16xf32> to vector<16xf32>
    %18 = vector.shape_cast %17 : vector<16xf32> to vector<1x16xf32>
    %19 = vector.shape_cast %18 : vector<1x16xf32> to vector<1x1x1x16xf32>
    %c0_16 = arith.constant 0 : index
    %c0_17 = arith.constant 0 : index
    %c0_18 = arith.constant 0 : index
    %c0_19 = arith.constant 0 : index
    %20 = vector.load %arg6[%c0_16, %c0_17, %c0_18, %c0_19] : memref<1x1x1x16xf32, #tpu.memory_space<vmem>>, vector<1x1x1x16xf32>
    tpu.vector_store %arg6[%c0_16, %c0_17, %c0_18, %c0_19], %19 {strides = array<i32>} : memref<1x1x1x16xf32, #tpu.memory_space<vmem>>, vector<1x1x1x16xf32>,
    return
  }
  func.func @transform_0(%arg0: i32, %arg1: i32) -> (i32, i32, i32, i32) {
    %c0_i32 = arith.constant 0 : i32
    %c0_i32_0 = arith.constant 0 : i32
    %c0_i32_1 = arith.constant 0 : i32
    return %arg0, %c0_i32, %arg1, %c0_i32_0 : i32, i32, i32, i32
  }
  func.func @transform_1(%arg0: i32, %arg1: i32) -> (i32, i32, i32) {
    %c0_i32 = arith.constant 0 : i32
    %c0_i32_0 = arith.constant 0 : i32
    %c0_i32_1 = arith.constant 0 : i32
    %c0_i32_2 = arith.constant 0 : i32
    return %c0_i32, %c0_i32_0, %c0_i32_1 : i32, i32, i32
  }
  func.func @transform_2(%arg0: i32, %arg1: i32) -> (i32, i32, i32) {
    %c0_i32 = arith.constant 0 : i32
    %c0_i32_0 = arith.constant 0 : i32
    return %arg0, %arg1, %c0_i32 : i32, i32, i32
  }
  func.func @transform_3(%arg0: i32, %arg1: i32) -> (i32, i32, i32, i32) {
    %c0_i32 = arith.constant 0 : i32
    %c0_i32_0 = arith.constant 0 : i32
    %c0_i32_1 = arith.constant 0 : i32
    return %arg0, %arg1, %c0_i32, %c0_i32_0 : i32, i32, i32, i32
  }
  func.func @transform_4(%arg0: i32, %arg1: i32) -> (i32, i32, i32, i32) {
    %c0_i32 = arith.constant 0 : i32
    %c0_i32_0 = arith.constant 0 : i32
    %c0_i32_1 = arith.constant 0 : i32
    return %arg0, %arg1, %c0_i32, %c0_i32_0 : i32, i32, i32, i32
  }
}

module attributes {stable_mosaic.version = 11 : i64} {
  func.func @_bn_relu_kernel(%arg0: i32, %arg1: memref<16x128xbf16, #tpu.memory_space<vmem>>, %arg2: memref<1x128xf32, #tpu.memory_space<vmem>>, %arg3: memref<1x128xf32, #tpu.memory_space<vmem>>, %arg4: memref<16x128xbf16, #tpu.memory_space<vmem>>) attributes {dimension_semantics = [#tpu.dimension_semantics<parallel>], iteration_bounds = array<i64: 1>, scalar_prefetch = 0 : i64, scratch_operands = 0 : i64, tpu.core_type = #tpu.core_type<tc>, window_params = [{transform_indices = @transform_0, window_bounds = array<i64: 16, 128>}, {pipeline_mode = #tpu.pipeline_mode<synchronous>, transform_indices = @transform_1, window_bounds = array<i64: 1, 128>}, {pipeline_mode = #tpu.pipeline_mode<synchronous>, transform_indices = @transform_2, window_bounds = array<i64: 1, 128>}, {transform_indices = @transform_3, window_bounds = array<i64: 16, 128>}]} {
    %c0 = arith.constant 0 : index
    %c0_0 = arith.constant 0 : index
    %0 = vector.load %arg1[%c0, %c0_0] : memref<16x128xbf16, #tpu.memory_space<vmem>>, vector<16x128xbf16>
    %1 = arith.extf %0 : vector<16x128xbf16> to vector<16x128xf32>
    %c0_1 = arith.constant 0 : index
    %c0_2 = arith.constant 0 : index
    %2 = vector.load %arg2[%c0_1, %c0_2] : memref<1x128xf32, #tpu.memory_space<vmem>>, vector<1x128xf32>
    %3 = vector.broadcast %2 : vector<1x128xf32> to vector<16x128xf32>
    %4 = arith.mulf %1, %3 : vector<16x128xf32>
    %c0_3 = arith.constant 0 : index
    %c0_4 = arith.constant 0 : index
    %5 = vector.load %arg3[%c0_3, %c0_4] : memref<1x128xf32, #tpu.memory_space<vmem>>, vector<1x128xf32>
    %6 = vector.broadcast %5 : vector<1x128xf32> to vector<16x128xf32>
    %7 = arith.addf %4, %6 : vector<16x128xf32>
    %cst = arith.constant 0.000000e+00 : f32
    %8 = vector.broadcast %cst : f32 to vector<16x128xf32>
    %9 = arith.maximumf %7, %8 : vector<16x128xf32>
    %10 = arith.truncf %9 : vector<16x128xf32> to vector<16x128xbf16>
    %c0_5 = arith.constant 0 : index
    %c0_6 = arith.constant 0 : index
    %11 = vector.load %arg4[%c0_5, %c0_6] : memref<16x128xbf16, #tpu.memory_space<vmem>>, vector<16x128xbf16>
    tpu.vector_store %arg4[%c0_5, %c0_6], %10 {strides = array<i32>} : memref<16x128xbf16, #tpu.memory_space<vmem>>, vector<16x128xbf16>,
    return
  }
  func.func @transform_0(%arg0: i32) -> (i32, i32) {
    %c0_i32 = arith.constant 0 : i32
    %c0_i32_0 = arith.constant 0 : i32
    return %arg0, %c0_i32 : i32, i32
  }
  func.func @transform_1(%arg0: i32) -> (i32, i32) {
    %c0_i32 = arith.constant 0 : i32
    %c0_i32_0 = arith.constant 0 : i32
    %c0_i32_1 = arith.constant 0 : i32
    return %c0_i32, %c0_i32_0 : i32, i32
  }
  func.func @transform_2(%arg0: i32) -> (i32, i32) {
    %c0_i32 = arith.constant 0 : i32
    %c0_i32_0 = arith.constant 0 : i32
    %c0_i32_1 = arith.constant 0 : i32
    return %c0_i32, %c0_i32_0 : i32, i32
  }
  func.func @transform_3(%arg0: i32) -> (i32, i32) {
    %c0_i32 = arith.constant 0 : i32
    %c0_i32_0 = arith.constant 0 : i32
    return %arg0, %c0_i32 : i32, i32
  }
}

module attributes {stable_mosaic.version = 11 : i64} {
  func.func @_conv3x3_s2_kernel(%arg0: i32, %arg1: i32, %arg2: memref<1x3x16x48xbf16, #tpu.memory_space<vmem>>, %arg3: memref<3x48x32xbf16, #tpu.memory_space<vmem>>, %arg4: memref<1x16x32xbf16, #tpu.memory_space<vmem>>, %arg5: memref<1x1x1x32xf32, #tpu.memory_space<vmem>>, %arg6: memref<1x1x1x32xf32, #tpu.memory_space<vmem>>) attributes {dimension_semantics = [#tpu.dimension_semantics<parallel>, #tpu.dimension_semantics<parallel>], iteration_bounds = array<i64: 2, 1>, scalar_prefetch = 0 : i64, scratch_operands = 0 : i64, tpu.core_type = #tpu.core_type<tc>, window_params = [{transform_indices = @transform_0, window_bounds = array<i64: 1, 3, 16, 48>}, {pipeline_mode = #tpu.pipeline_mode<synchronous>, transform_indices = @transform_1, window_bounds = array<i64: 3, 48, 32>}, {transform_indices = @transform_2, window_bounds = array<i64: 1, 16, 32>}, {transform_indices = @transform_3, window_bounds = array<i64: 1, 1, 1, 32>}, {transform_indices = @transform_4, window_bounds = array<i64: 1, 1, 1, 32>}]} {
    %c0 = arith.constant 0 : index
    %c0_0 = arith.constant 0 : index
    %c0_1 = arith.constant 0 : index
    %c0_2 = arith.constant 0 : index
    %0 = vector.load %arg2[%c0, %c0_0, %c0_1, %c0_2] : memref<1x3x16x48xbf16, #tpu.memory_space<vmem>>, vector<1x1x16x48xbf16>
    %1 = vector.shape_cast %0 : vector<1x1x16x48xbf16> to vector<16x48xbf16>
    %c0_3 = arith.constant 0 : index
    %c0_4 = arith.constant 0 : index
    %c0_5 = arith.constant 0 : index
    %2 = vector.load %arg3[%c0_3, %c0_4, %c0_5] : memref<3x48x32xbf16, #tpu.memory_space<vmem>>, vector<1x48x32xbf16>
    %3 = vector.shape_cast %2 : vector<1x48x32xbf16> to vector<48x32xbf16>
    %cst = arith.constant dense<0.000000e+00> : vector<16x32xf32>
    %4 = tpu.matmul %1, %3, %cst {dimension_numbers = #tpu.dot_dimension_numbers<[1], [0], [0], [1], [0, 0, 1, 1], [], []>} : vector<16x48xbf16>, vector<48x32xbf16>, vector<16x32xf32> -> vector<16x32xf32>
    %c0_6 = arith.constant 0 : index
    %c1 = arith.constant 1 : index
    %c0_7 = arith.constant 0 : index
    %c0_8 = arith.constant 0 : index
    %5 = vector.load %arg2[%c0_6, %c1, %c0_7, %c0_8] : memref<1x3x16x48xbf16, #tpu.memory_space<vmem>>, vector<1x1x16x48xbf16>
    %6 = vector.shape_cast %5 : vector<1x1x16x48xbf16> to vector<16x48xbf16>
    %c1_9 = arith.constant 1 : index
    %c0_10 = arith.constant 0 : index
    %c0_11 = arith.constant 0 : index
    %7 = vector.load %arg3[%c1_9, %c0_10, %c0_11] : memref<3x48x32xbf16, #tpu.memory_space<vmem>>, vector<1x48x32xbf16>
    %8 = vector.shape_cast %7 : vector<1x48x32xbf16> to vector<48x32xbf16>
    %cst_12 = arith.constant dense<0.000000e+00> : vector<16x32xf32>
    %9 = tpu.matmul %6, %8, %cst_12 {dimension_numbers = #tpu.dot_dimension_numbers<[1], [0], [0], [1], [0, 0, 1, 1], [], []>} : vector<16x48xbf16>, vector<48x32xbf16>, vector<16x32xf32> -> vector<16x32xf32>
    %10 = arith.addf %4, %9 : vector<16x32xf32>
    %c0_13 = arith.constant 0 : index
    %c2 = arith.constant 2 : index
    %c0_14 = arith.constant 0 : index
    %c0_15 = arith.constant 0 : index
    %11 = vector.load %arg2[%c0_13, %c2, %c0_14, %c0_15] : memref<1x3x16x48xbf16, #tpu.memory_space<vmem>>, vector<1x1x16x48xbf16>
    %12 = vector.shape_cast %11 : vector<1x1x16x48xbf16> to vector<16x48xbf16>
    %c2_16 = arith.constant 2 : index
    %c0_17 = arith.constant 0 : index
    %c0_18 = arith.constant 0 : index
    %13 = vector.load %arg3[%c2_16, %c0_17, %c0_18] : memref<3x48x32xbf16, #tpu.memory_space<vmem>>, vector<1x48x32xbf16>
    %14 = vector.shape_cast %13 : vector<1x48x32xbf16> to vector<48x32xbf16>
    %cst_19 = arith.constant dense<0.000000e+00> : vector<16x32xf32>
    %15 = tpu.matmul %12, %14, %cst_19 {dimension_numbers = #tpu.dot_dimension_numbers<[1], [0], [0], [1], [0, 0, 1, 1], [], []>} : vector<16x48xbf16>, vector<48x32xbf16>, vector<16x32xf32> -> vector<16x32xf32>
    %16 = arith.addf %10, %15 : vector<16x32xf32>
    %17 = vector.shape_cast %16 : vector<16x32xf32> to vector<1x16x32xf32>
    %18 = arith.truncf %17 : vector<1x16x32xf32> to vector<1x16x32xbf16>
    %c0_20 = arith.constant 0 : index
    %c0_21 = arith.constant 0 : index
    %c0_22 = arith.constant 0 : index
    %19 = vector.load %arg4[%c0_20, %c0_21, %c0_22] : memref<1x16x32xbf16, #tpu.memory_space<vmem>>, vector<1x16x32xbf16>
    tpu.vector_store %arg4[%c0_20, %c0_21, %c0_22], %18 {strides = array<i32>} : memref<1x16x32xbf16, #tpu.memory_space<vmem>>, vector<1x16x32xbf16>,
    %cst_23 = arith.constant dense<0.000000e+00> : vector<32xf32>
    %20 = vector.multi_reduction <add>, %16, %cst_23 [0] : vector<16x32xf32> to vector<32xf32>
    %21 = vector.shape_cast %20 : vector<32xf32> to vector<1x32xf32>
    %cst_24 = arith.constant 6.250000e-02 : f32
    %22 = vector.broadcast %cst_24 : f32 to vector<1x32xf32>
    %23 = arith.mulf %21, %22 : vector<1x32xf32>
    %24 = vector.broadcast %23 : vector<1x32xf32> to vector<16x32xf32>
    %25 = arith.subf %16, %24 : vector<16x32xf32>
    %26 = vector.shape_cast %21 : vector<1x32xf32> to vector<1x1x1x32xf32>
    %c0_25 = arith.constant 0 : index
    %c0_26 = arith.constant 0 : index
    %c0_27 = arith.constant 0 : index
    %c0_28 = arith.constant 0 : index
    %27 = vector.load %arg5[%c0_25, %c0_26, %c0_27, %c0_28] : memref<1x1x1x32xf32, #tpu.memory_space<vmem>>, vector<1x1x1x32xf32>
    tpu.vector_store %arg5[%c0_25, %c0_26, %c0_27, %c0_28], %26 {strides = array<i32>} : memref<1x1x1x32xf32, #tpu.memory_space<vmem>>, vector<1x1x1x32xf32>,
    %28 = arith.mulf %25, %25 : vector<16x32xf32>
    %cst_29 = arith.constant dense<0.000000e+00> : vector<32xf32>
    %29 = vector.multi_reduction <add>, %28, %cst_29 [0] : vector<16x32xf32> to vector<32xf32>
    %30 = vector.shape_cast %29 : vector<32xf32> to vector<1x32xf32>
    %31 = vector.shape_cast %30 : vector<1x32xf32> to vector<1x1x1x32xf32>
    %c0_30 = arith.constant 0 : index
    %c0_31 = arith.constant 0 : index
    %c0_32 = arith.constant 0 : index
    %c0_33 = arith.constant 0 : index
    %32 = vector.load %arg6[%c0_30, %c0_31, %c0_32, %c0_33] : memref<1x1x1x32xf32, #tpu.memory_space<vmem>>, vector<1x1x1x32xf32>
    tpu.vector_store %arg6[%c0_30, %c0_31, %c0_32, %c0_33], %31 {strides = array<i32>} : memref<1x1x1x32xf32, #tpu.memory_space<vmem>>, vector<1x1x1x32xf32>,
    return
  }
  func.func @transform_0(%arg0: i32, %arg1: i32) -> (i32, i32, i32, i32) {
    %c0_i32 = arith.constant 0 : i32
    %c0_i32_0 = arith.constant 0 : i32
    %c0_i32_1 = arith.constant 0 : i32
    return %arg0, %c0_i32, %arg1, %c0_i32_0 : i32, i32, i32, i32
  }
  func.func @transform_1(%arg0: i32, %arg1: i32) -> (i32, i32, i32) {
    %c0_i32 = arith.constant 0 : i32
    %c0_i32_0 = arith.constant 0 : i32
    %c0_i32_1 = arith.constant 0 : i32
    %c0_i32_2 = arith.constant 0 : i32
    return %c0_i32, %c0_i32_0, %c0_i32_1 : i32, i32, i32
  }
  func.func @transform_2(%arg0: i32, %arg1: i32) -> (i32, i32, i32) {
    %c0_i32 = arith.constant 0 : i32
    %c0_i32_0 = arith.constant 0 : i32
    return %arg0, %arg1, %c0_i32 : i32, i32, i32
  }
  func.func @transform_3(%arg0: i32, %arg1: i32) -> (i32, i32, i32, i32) {
    %c0_i32 = arith.constant 0 : i32
    %c0_i32_0 = arith.constant 0 : i32
    %c0_i32_1 = arith.constant 0 : i32
    return %arg0, %arg1, %c0_i32, %c0_i32_0 : i32, i32, i32, i32
  }
  func.func @transform_4(%arg0: i32, %arg1: i32) -> (i32, i32, i32, i32) {
    %c0_i32 = arith.constant 0 : i32
    %c0_i32_0 = arith.constant 0 : i32
    %c0_i32_1 = arith.constant 0 : i32
    return %arg0, %arg1, %c0_i32, %c0_i32_0 : i32, i32, i32, i32
  }
}

module attributes {stable_mosaic.version = 11 : i64} {
  func.func @_bn_relu_kernel(%arg0: i32, %arg1: memref<8x128xbf16, #tpu.memory_space<vmem>>, %arg2: memref<1x128xf32, #tpu.memory_space<vmem>>, %arg3: memref<1x128xf32, #tpu.memory_space<vmem>>, %arg4: memref<8x128xbf16, #tpu.memory_space<vmem>>) attributes {dimension_semantics = [#tpu.dimension_semantics<parallel>], iteration_bounds = array<i64: 1>, scalar_prefetch = 0 : i64, scratch_operands = 0 : i64, tpu.core_type = #tpu.core_type<tc>, window_params = [{transform_indices = @transform_0, window_bounds = array<i64: 8, 128>}, {pipeline_mode = #tpu.pipeline_mode<synchronous>, transform_indices = @transform_1, window_bounds = array<i64: 1, 128>}, {pipeline_mode = #tpu.pipeline_mode<synchronous>, transform_indices = @transform_2, window_bounds = array<i64: 1, 128>}, {transform_indices = @transform_3, window_bounds = array<i64: 8, 128>}]} {
    %c0 = arith.constant 0 : index
    %c0_0 = arith.constant 0 : index
    %0 = vector.load %arg1[%c0, %c0_0] : memref<8x128xbf16, #tpu.memory_space<vmem>>, vector<8x128xbf16>
    %1 = arith.extf %0 : vector<8x128xbf16> to vector<8x128xf32>
    %c0_1 = arith.constant 0 : index
    %c0_2 = arith.constant 0 : index
    %2 = vector.load %arg2[%c0_1, %c0_2] : memref<1x128xf32, #tpu.memory_space<vmem>>, vector<1x128xf32>
    %3 = vector.broadcast %2 : vector<1x128xf32> to vector<8x128xf32>
    %4 = arith.mulf %1, %3 : vector<8x128xf32>
    %c0_3 = arith.constant 0 : index
    %c0_4 = arith.constant 0 : index
    %5 = vector.load %arg3[%c0_3, %c0_4] : memref<1x128xf32, #tpu.memory_space<vmem>>, vector<1x128xf32>
    %6 = vector.broadcast %5 : vector<1x128xf32> to vector<8x128xf32>
    %7 = arith.addf %4, %6 : vector<8x128xf32>
    %cst = arith.constant 0.000000e+00 : f32
    %8 = vector.broadcast %cst : f32 to vector<8x128xf32>
    %9 = arith.maximumf %7, %8 : vector<8x128xf32>
    %10 = arith.truncf %9 : vector<8x128xf32> to vector<8x128xbf16>
    %c0_5 = arith.constant 0 : index
    %c0_6 = arith.constant 0 : index
    %11 = vector.load %arg4[%c0_5, %c0_6] : memref<8x128xbf16, #tpu.memory_space<vmem>>, vector<8x128xbf16>
    tpu.vector_store %arg4[%c0_5, %c0_6], %10 {strides = array<i32>} : memref<8x128xbf16, #tpu.memory_space<vmem>>, vector<8x128xbf16>,
    return
  }
  func.func @transform_0(%arg0: i32) -> (i32, i32) {
    %c0_i32 = arith.constant 0 : i32
    %c0_i32_0 = arith.constant 0 : i32
    return %arg0, %c0_i32 : i32, i32
  }
  func.func @transform_1(%arg0: i32) -> (i32, i32) {
    %c0_i32 = arith.constant 0 : i32
    %c0_i32_0 = arith.constant 0 : i32
    %c0_i32_1 = arith.constant 0 : i32
    return %c0_i32, %c0_i32_0 : i32, i32
  }
  func.func @transform_2(%arg0: i32) -> (i32, i32) {
    %c0_i32 = arith.constant 0 : i32
    %c0_i32_0 = arith.constant 0 : i32
    %c0_i32_1 = arith.constant 0 : i32
    return %c0_i32, %c0_i32_0 : i32, i32
  }
  func.func @transform_3(%arg0: i32) -> (i32, i32) {
    %c0_i32 = arith.constant 0 : i32
    %c0_i32_0 = arith.constant 0 : i32
    return %arg0, %c0_i32 : i32, i32
  }
}

module attributes {stable_mosaic.version = 11 : i64} {
  func.func @_conv3x3_s2_kernel(%arg0: i32, %arg1: i32, %arg2: memref<1x3x4x96xbf16, #tpu.memory_space<vmem>>, %arg3: memref<3x96x64xbf16, #tpu.memory_space<vmem>>, %arg4: memref<1x4x64xbf16, #tpu.memory_space<vmem>>, %arg5: memref<1x1x1x64xf32, #tpu.memory_space<vmem>>, %arg6: memref<1x1x1x64xf32, #tpu.memory_space<vmem>>) attributes {dimension_semantics = [#tpu.dimension_semantics<parallel>, #tpu.dimension_semantics<parallel>], iteration_bounds = array<i64: 2, 1>, scalar_prefetch = 0 : i64, scratch_operands = 0 : i64, tpu.core_type = #tpu.core_type<tc>, window_params = [{transform_indices = @transform_0, window_bounds = array<i64: 1, 3, 4, 96>}, {pipeline_mode = #tpu.pipeline_mode<synchronous>, transform_indices = @transform_1, window_bounds = array<i64: 3, 96, 64>}, {transform_indices = @transform_2, window_bounds = array<i64: 1, 4, 64>}, {transform_indices = @transform_3, window_bounds = array<i64: 1, 1, 1, 64>}, {transform_indices = @transform_4, window_bounds = array<i64: 1, 1, 1, 64>}]} {
    %c0 = arith.constant 0 : index
    %c0_0 = arith.constant 0 : index
    %c0_1 = arith.constant 0 : index
    %c0_2 = arith.constant 0 : index
    %0 = vector.load %arg2[%c0, %c0_0, %c0_1, %c0_2] : memref<1x3x4x96xbf16, #tpu.memory_space<vmem>>, vector<1x1x4x96xbf16>
    %1 = vector.shape_cast %0 : vector<1x1x4x96xbf16> to vector<4x96xbf16>
    %c0_3 = arith.constant 0 : index
    %c0_4 = arith.constant 0 : index
    %c0_5 = arith.constant 0 : index
    %2 = vector.load %arg3[%c0_3, %c0_4, %c0_5] : memref<3x96x64xbf16, #tpu.memory_space<vmem>>, vector<1x96x64xbf16>
    %3 = vector.shape_cast %2 : vector<1x96x64xbf16> to vector<96x64xbf16>
    %cst = arith.constant dense<0.000000e+00> : vector<4x64xf32>
    %4 = tpu.matmul %1, %3, %cst {dimension_numbers = #tpu.dot_dimension_numbers<[1], [0], [0], [1], [0, 0, 1, 1], [], []>} : vector<4x96xbf16>, vector<96x64xbf16>, vector<4x64xf32> -> vector<4x64xf32>
    %c0_6 = arith.constant 0 : index
    %c1 = arith.constant 1 : index
    %c0_7 = arith.constant 0 : index
    %c0_8 = arith.constant 0 : index
    %5 = vector.load %arg2[%c0_6, %c1, %c0_7, %c0_8] : memref<1x3x4x96xbf16, #tpu.memory_space<vmem>>, vector<1x1x4x96xbf16>
    %6 = vector.shape_cast %5 : vector<1x1x4x96xbf16> to vector<4x96xbf16>
    %c1_9 = arith.constant 1 : index
    %c0_10 = arith.constant 0 : index
    %c0_11 = arith.constant 0 : index
    %7 = vector.load %arg3[%c1_9, %c0_10, %c0_11] : memref<3x96x64xbf16, #tpu.memory_space<vmem>>, vector<1x96x64xbf16>
    %8 = vector.shape_cast %7 : vector<1x96x64xbf16> to vector<96x64xbf16>
    %cst_12 = arith.constant dense<0.000000e+00> : vector<4x64xf32>
    %9 = tpu.matmul %6, %8, %cst_12 {dimension_numbers = #tpu.dot_dimension_numbers<[1], [0], [0], [1], [0, 0, 1, 1], [], []>} : vector<4x96xbf16>, vector<96x64xbf16>, vector<4x64xf32> -> vector<4x64xf32>
    %10 = arith.addf %4, %9 : vector<4x64xf32>
    %c0_13 = arith.constant 0 : index
    %c2 = arith.constant 2 : index
    %c0_14 = arith.constant 0 : index
    %c0_15 = arith.constant 0 : index
    %11 = vector.load %arg2[%c0_13, %c2, %c0_14, %c0_15] : memref<1x3x4x96xbf16, #tpu.memory_space<vmem>>, vector<1x1x4x96xbf16>
    %12 = vector.shape_cast %11 : vector<1x1x4x96xbf16> to vector<4x96xbf16>
    %c2_16 = arith.constant 2 : index
    %c0_17 = arith.constant 0 : index
    %c0_18 = arith.constant 0 : index
    %13 = vector.load %arg3[%c2_16, %c0_17, %c0_18] : memref<3x96x64xbf16, #tpu.memory_space<vmem>>, vector<1x96x64xbf16>
    %14 = vector.shape_cast %13 : vector<1x96x64xbf16> to vector<96x64xbf16>
    %cst_19 = arith.constant dense<0.000000e+00> : vector<4x64xf32>
    %15 = tpu.matmul %12, %14, %cst_19 {dimension_numbers = #tpu.dot_dimension_numbers<[1], [0], [0], [1], [0, 0, 1, 1], [], []>} : vector<4x96xbf16>, vector<96x64xbf16>, vector<4x64xf32> -> vector<4x64xf32>
    %16 = arith.addf %10, %15 : vector<4x64xf32>
    %17 = vector.shape_cast %16 : vector<4x64xf32> to vector<1x4x64xf32>
    %18 = arith.truncf %17 : vector<1x4x64xf32> to vector<1x4x64xbf16>
    %c0_20 = arith.constant 0 : index
    %c0_21 = arith.constant 0 : index
    %c0_22 = arith.constant 0 : index
    %19 = vector.load %arg4[%c0_20, %c0_21, %c0_22] : memref<1x4x64xbf16, #tpu.memory_space<vmem>>, vector<1x4x64xbf16>
    tpu.vector_store %arg4[%c0_20, %c0_21, %c0_22], %18 {strides = array<i32>} : memref<1x4x64xbf16, #tpu.memory_space<vmem>>, vector<1x4x64xbf16>,
    %cst_23 = arith.constant dense<0.000000e+00> : vector<64xf32>
    %20 = vector.multi_reduction <add>, %16, %cst_23 [0] : vector<4x64xf32> to vector<64xf32>
    %21 = vector.shape_cast %20 : vector<64xf32> to vector<1x64xf32>
    %cst_24 = arith.constant 2.500000e-01 : f32
    %22 = vector.broadcast %cst_24 : f32 to vector<1x64xf32>
    %23 = arith.mulf %21, %22 : vector<1x64xf32>
    %24 = vector.broadcast %23 : vector<1x64xf32> to vector<4x64xf32>
    %25 = arith.subf %16, %24 : vector<4x64xf32>
    %26 = vector.shape_cast %21 : vector<1x64xf32> to vector<1x1x1x64xf32>
    %c0_25 = arith.constant 0 : index
    %c0_26 = arith.constant 0 : index
    %c0_27 = arith.constant 0 : index
    %c0_28 = arith.constant 0 : index
    %27 = vector.load %arg5[%c0_25, %c0_26, %c0_27, %c0_28] : memref<1x1x1x64xf32, #tpu.memory_space<vmem>>, vector<1x1x1x64xf32>
    tpu.vector_store %arg5[%c0_25, %c0_26, %c0_27, %c0_28], %26 {strides = array<i32>} : memref<1x1x1x64xf32, #tpu.memory_space<vmem>>, vector<1x1x1x64xf32>,
    %28 = arith.mulf %25, %25 : vector<4x64xf32>
    %cst_29 = arith.constant dense<0.000000e+00> : vector<64xf32>
    %29 = vector.multi_reduction <add>, %28, %cst_29 [0] : vector<4x64xf32> to vector<64xf32>
    %30 = vector.shape_cast %29 : vector<64xf32> to vector<1x64xf32>
    %31 = vector.shape_cast %30 : vector<1x64xf32> to vector<1x1x1x64xf32>
    %c0_30 = arith.constant 0 : index
    %c0_31 = arith.constant 0 : index
    %c0_32 = arith.constant 0 : index
    %c0_33 = arith.constant 0 : index
    %32 = vector.load %arg6[%c0_30, %c0_31, %c0_32, %c0_33] : memref<1x1x1x64xf32, #tpu.memory_space<vmem>>, vector<1x1x1x64xf32>
    tpu.vector_store %arg6[%c0_30, %c0_31, %c0_32, %c0_33], %31 {strides = array<i32>} : memref<1x1x1x64xf32, #tpu.memory_space<vmem>>, vector<1x1x1x64xf32>,
    return
  }
  func.func @transform_0(%arg0: i32, %arg1: i32) -> (i32, i32, i32, i32) {
    %c0_i32 = arith.constant 0 : i32
    %c0_i32_0 = arith.constant 0 : i32
    %c0_i32_1 = arith.constant 0 : i32
    return %arg0, %c0_i32, %arg1, %c0_i32_0 : i32, i32, i32, i32
  }
  func.func @transform_1(%arg0: i32, %arg1: i32) -> (i32, i32, i32) {
    %c0_i32 = arith.constant 0 : i32
    %c0_i32_0 = arith.constant 0 : i32
    %c0_i32_1 = arith.constant 0 : i32
    %c0_i32_2 = arith.constant 0 : i32
    return %c0_i32, %c0_i32_0, %c0_i32_1 : i32, i32, i32
  }
  func.func @transform_2(%arg0: i32, %arg1: i32) -> (i32, i32, i32) {
    %c0_i32 = arith.constant 0 : i32
    %c0_i32_0 = arith.constant 0 : i32
    return %arg0, %arg1, %c0_i32 : i32, i32, i32
  }
  func.func @transform_3(%arg0: i32, %arg1: i32) -> (i32, i32, i32, i32) {
    %c0_i32 = arith.constant 0 : i32
    %c0_i32_0 = arith.constant 0 : i32
    %c0_i32_1 = arith.constant 0 : i32
    return %arg0, %arg1, %c0_i32, %c0_i32_0 : i32, i32, i32, i32
  }
  func.func @transform_4(%arg0: i32, %arg1: i32) -> (i32, i32, i32, i32) {
    %c0_i32 = arith.constant 0 : i32
    %c0_i32_0 = arith.constant 0 : i32
    %c0_i32_1 = arith.constant 0 : i32
    return %arg0, %arg1, %c0_i32, %c0_i32_0 : i32, i32, i32, i32
  }
}

module attributes {stable_mosaic.version = 11 : i64} {
  func.func @_bn_relu_matmul_bias_kernel(%arg0: i32, %arg1: i32, %arg2: memref<8x64xbf16, #tpu.memory_space<vmem>>, %arg3: memref<1x64xf32, #tpu.memory_space<vmem>>, %arg4: memref<1x64xf32, #tpu.memory_space<vmem>>, %arg5: memref<64x64xbf16, #tpu.memory_space<vmem>>, %arg6: memref<1x64xf32, #tpu.memory_space<vmem>>, %arg7: memref<8x64xf32, #tpu.memory_space<vmem>>, %arg8: memref<8x64xf32, #tpu.memory_space<vmem>>) attributes {dimension_semantics = [#tpu.dimension_semantics<parallel>, #tpu.dimension_semantics<arbitrary>], iteration_bounds = array<i64: 1, 1>, scalar_prefetch = 0 : i64, scratch_operands = 1 : i64, tpu.core_type = #tpu.core_type<tc>, window_params = [{transform_indices = @transform_0, window_bounds = array<i64: 8, 64>}, {transform_indices = @transform_1, window_bounds = array<i64: 1, 64>}, {transform_indices = @transform_2, window_bounds = array<i64: 1, 64>}, {transform_indices = @transform_3, window_bounds = array<i64: 64, 64>}, {pipeline_mode = #tpu.pipeline_mode<synchronous>, transform_indices = @transform_4, window_bounds = array<i64: 1, 64>}, {transform_indices = @transform_5, window_bounds = array<i64: 8, 64>}]} {
    %c0_i32 = arith.constant 0 : i32
    %0 = arith.cmpi eq, %arg1, %c0_i32 : i32
    %1 = arith.extui %0 : i1 to i32
    %c0_i32_0 = arith.constant 0 : i32
    %2 = arith.cmpi ne, %1, %c0_i32_0 : i32
    scf.if %2 {
      %cst_15 = arith.constant 0.000000e+00 : f32
      %22 = vector.broadcast %cst_15 : f32 to vector<8x64xf32>
      %c0_16 = arith.constant 0 : index
      %c0_17 = arith.constant 0 : index
      %23 = vector.load %arg8[%c0_16, %c0_17] : memref<8x64xf32, #tpu.memory_space<vmem>>, vector<8x64xf32>
      tpu.vector_store %arg8[%c0_16, %c0_17], %22 {strides = array<i32>} : memref<8x64xf32, #tpu.memory_space<vmem>>, vector<8x64xf32>,
    } else {
    }
    %c0 = arith.constant 0 : index
    %c0_1 = arith.constant 0 : index
    %3 = vector.load %arg2[%c0, %c0_1] : memref<8x64xbf16, #tpu.memory_space<vmem>>, vector<8x64xbf16>
    %4 = arith.extf %3 : vector<8x64xbf16> to vector<8x64xf32>
    %c0_2 = arith.constant 0 : index
    %c0_3 = arith.constant 0 : index
    %5 = vector.load %arg3[%c0_2, %c0_3] : memref<1x64xf32, #tpu.memory_space<vmem>>, vector<1x64xf32>
    %6 = vector.broadcast %5 : vector<1x64xf32> to vector<8x64xf32>
    %7 = arith.mulf %4, %6 : vector<8x64xf32>
    %c0_4 = arith.constant 0 : index
    %c0_5 = arith.constant 0 : index
    %8 = vector.load %arg4[%c0_4, %c0_5] : memref<1x64xf32, #tpu.memory_space<vmem>>, vector<1x64xf32>
    %9 = vector.broadcast %8 : vector<1x64xf32> to vector<8x64xf32>
    %10 = arith.addf %7, %9 : vector<8x64xf32>
    %cst = arith.constant 0.000000e+00 : f32
    %11 = vector.broadcast %cst : f32 to vector<8x64xf32>
    %12 = arith.maximumf %10, %11 : vector<8x64xf32>
    %13 = arith.truncf %12 : vector<8x64xf32> to vector<8x64xbf16>
    %c0_6 = arith.constant 0 : index
    %c0_7 = arith.constant 0 : index
    %14 = vector.load %arg8[%c0_6, %c0_7] : memref<8x64xf32, #tpu.memory_space<vmem>>, vector<8x64xf32>
    %c0_8 = arith.constant 0 : index
    %c0_9 = arith.constant 0 : index
    %15 = vector.load %arg5[%c0_8, %c0_9] : memref<64x64xbf16, #tpu.memory_space<vmem>>, vector<64x64xbf16>
    %cst_10 = arith.constant dense<0.000000e+00> : vector<8x64xf32>
    %16 = tpu.matmul %13, %15, %cst_10 {dimension_numbers = #tpu.dot_dimension_numbers<[1], [0], [0], [1], [0, 0, 1, 1], [], []>} : vector<8x64xbf16>, vector<64x64xbf16>, vector<8x64xf32> -> vector<8x64xf32>
    %17 = arith.addf %14, %16 : vector<8x64xf32>
    %c0_11 = arith.constant 0 : index
    %c0_12 = arith.constant 0 : index
    %18 = vector.load %arg8[%c0_11, %c0_12] : memref<8x64xf32, #tpu.memory_space<vmem>>, vector<8x64xf32>
    tpu.vector_store %arg8[%c0_11, %c0_12], %17 {strides = array<i32>} : memref<8x64xf32, #tpu.memory_space<vmem>>, vector<8x64xf32>,
    %c0_i32_13 = arith.constant 0 : i32
    %19 = arith.cmpi eq, %arg1, %c0_i32_13 : i32
    %20 = arith.extui %19 : i1 to i32
    %c0_i32_14 = arith.constant 0 : i32
    %21 = arith.cmpi ne, %20, %c0_i32_14 : i32
    scf.if %21 {
      %c0_15 = arith.constant 0 : index
      %c0_16 = arith.constant 0 : index
      %22 = vector.load %arg8[%c0_15, %c0_16] : memref<8x64xf32, #tpu.memory_space<vmem>>, vector<8x64xf32>
      %c0_17 = arith.constant 0 : index
      %c0_18 = arith.constant 0 : index
      %23 = vector.load %arg6[%c0_17, %c0_18] : memref<1x64xf32, #tpu.memory_space<vmem>>, vector<1x64xf32>
      %24 = vector.broadcast %23 : vector<1x64xf32> to vector<8x64xf32>
      %25 = arith.addf %22, %24 : vector<8x64xf32>
      %c0_19 = arith.constant 0 : index
      %c0_20 = arith.constant 0 : index
      %26 = vector.load %arg7[%c0_19, %c0_20] : memref<8x64xf32, #tpu.memory_space<vmem>>, vector<8x64xf32>
      tpu.vector_store %arg7[%c0_19, %c0_20], %25 {strides = array<i32>} : memref<8x64xf32, #tpu.memory_space<vmem>>, vector<8x64xf32>,
    } else {
    }
    return
  }
  func.func @transform_0(%arg0: i32, %arg1: i32) -> (i32, i32) {
    %c0_i32 = arith.constant 0 : i32
    return %arg0, %arg1 : i32, i32
  }
  func.func @transform_1(%arg0: i32, %arg1: i32) -> (i32, i32) {
    %c0_i32 = arith.constant 0 : i32
    %c0_i32_0 = arith.constant 0 : i32
    return %c0_i32, %arg1 : i32, i32
  }
  func.func @transform_2(%arg0: i32, %arg1: i32) -> (i32, i32) {
    %c0_i32 = arith.constant 0 : i32
    %c0_i32_0 = arith.constant 0 : i32
    return %c0_i32, %arg1 : i32, i32
  }
  func.func @transform_3(%arg0: i32, %arg1: i32) -> (i32, i32) {
    %c0_i32 = arith.constant 0 : i32
    %c0_i32_0 = arith.constant 0 : i32
    return %arg1, %c0_i32 : i32, i32
  }
  func.func @transform_4(%arg0: i32, %arg1: i32) -> (i32, i32) {
    %c0_i32 = arith.constant 0 : i32
    %c0_i32_0 = arith.constant 0 : i32
    %c0_i32_1 = arith.constant 0 : i32
    return %c0_i32, %c0_i32_0 : i32, i32
  }
  func.func @transform_5(%arg0: i32, %arg1: i32) -> (i32, i32) {
    %c0_i32 = arith.constant 0 : i32
    %c0_i32_0 = arith.constant 0 : i32
    return %arg0, %c0_i32 : i32, i32
  }
}

</mosaic_0001>

<bundles_post_ra>
// kernel: tile.33
= control target key start
LH: loop header
LB: loop body
LE: loop exit
PB: predicated region body
PF: predicated region fallthrough
CT: control target
= control target key end

     0   :  { %s28_s0 = inlined_call_operand.vmem [shape: f32[8], index: 0, kind: input, shape index: {}]   ;;  %s29_s1 = inlined_call_operand.vmem [shape: f32[16,8], index: 1, kind: output, shape index: {}]  }
   0x1   :  { %v4_v0 = vld [vmem:[%s28_s0] ss:$0 sm:$0xff] }
   0x2   :  { %5 = vst [vmem:[%s29_s1] sm:$0xff] %v4_v0 }
   0x3   :  { %8 = vst [vmem:[%s29_s1 + $0x8] sm:$0xff] %v4_v0 }

// kernel: tile.34
= control target key start
LH: loop header
LB: loop body
LE: loop exit
PB: predicated region body
PF: predicated region fallthrough
CT: control target
= control target key end

     0   :  { %s131_s10 = smov 120   ;;  %s132_s11 = smov 104   ;;  %vm3_vm0 = vcmask 64512   ;;  %vm9_vm1 = vcmask 1048512   ;;  %vm15_vm2 = vcmask 982912   ;;  %vm21_vm3 = vcmask 917312   ;;  %s207_s0 = inlined_call_operand.vmem [shape: f32[16,8], index: 0, kind: input, shape index: {}]   ;;  %s208_s1 = inlined_call_operand.vmem [shape: f32[1,128], index: 1, kind: output, shape index: {}]  }
   0x1   :  { %v101_v0 = vld [vmem:[%s207_s0 + $0xf] sm:$0x1]   ;;  %v103_v1 = vld [vmem:[%s207_s0 + $0xd] sm:$0x1]   ;;  %v105_v2 = vld [vmem:[%s207_s0 + $0xb] sm:$0x1]  }
   0x2   :  { %7 = vrot.lane.b32.xlu0 %v101_v0, %s131_s10  ;;  %19 = vrot.lane.b32.xlu1 %v103_v1, %s132_s11  ;;  %s133_s14 = smov 88   ;;  %v102_v3 = vld [vmem:[%s207_s0 + $0xe] sm:$0x1]   ;;  %v104_v4 = vld [vmem:[%s207_s0 + $0xc] sm:$0x1]   ;;  %s134_s19 = smov 112  }
   0x3   :  { %31 = vrot.lane.b32.xlu2 %v105_v2, %s133_s14  ;;  %s135_s20 = smov 96   ;;  %v106_v5 = vld [vmem:[%s207_s0 + $0xa] sm:$0x1]   ;;  %s136_s23 = smov 80   ;;  %v107_v6 = vld [vmem:[%s207_s0 + $0x9] sm:$0x1]  }
   0x4   :  { %v108_v7 = vld [vmem:[%s207_s0 + $0x8] sm:$0x1]   ;;  %s137_s28 = smov 72   ;;  %s138_s29 = smov 64   ;;  %v109_v8 = vld [vmem:[%s207_s0 + $0x7] sm:$0x1]  }
   0x5   :  { %s139_s3 = smov 56   ;;  %v110_v9 = vld [vmem:[%s207_s0 + $0x6] sm:$0x1]   ;;  %v111_v10 = vld [vmem:[%s207_s0 + $0x5] sm:$0x1]   ;;  %s140_s8 = smov 48  }
   0x6   :  { %s141_s9 = smov 40   ;;  %v112_v11 = vld [vmem:[%s207_s0 + $0x4] sm:$0x1]   ;;  %s142_s12 = smov 32   ;;  %v113_v12 = vld [vmem:[%s207_s0 + $0x3] sm:$0x1]  }
   0x7   :  { %v114_v13 = vld [vmem:[%s207_s0 + $0x2] sm:$0x1]   ;;  %s143_s17 = smov 24   ;;  %s144_s18 = smov 16   ;;  %v115_v14 = vld [vmem:[%s207_s0 + $0x1] sm:$0x1]  }
   0x8   :  { %s145_s21 = smov 8   ;;  %v2_v15 = vld [vmem:[%s207_s0] sm:$0x1]   ;;  %vm27_vm4 = vcmask 851712   ;;  %vm33_vm5 = vcmask 786112   ;;  %vm39_vm6 = vcmask 720512  }
   0x9   :  { %4 = vst.msk [vmem:[#allocation0] sm:$0x1] %vm3_vm0, %v2_v15   ;;  %vm45_vm7 = vcmask 654912   ;;  %vm51_vm8 = vcmask 589312   ;;  %vm57_vm9 = vcmask 523712   ;;  %vm63_vm10 = vcmask 458112  }
   0xa   :  { %13 = vrot.lane.b32.xlu0 %v102_v3, %s134_s19  ;;  %25 = vrot.lane.b32.xlu1 %v104_v4, %s135_s20  ;;  %vm69_vm11 = vcmask 392512   ;;  %vm75_vm12 = vcmask 326912   ;;  %vm81_vm13 = vcmask 261312   ;;  %vm87_vm14 = vcmask 195712  }
   0xb   :  { %37 = vrot.lane.b32.xlu2 %v106_v5, %s136_s23  ;;  %vm93_vm15 = vcmask 130112  }
  0x12   :  { %43 = vrot.lane.b32.xlu0 %v107_v6, %s137_s28  ;;  %49 = vrot.lane.b32.xlu1 %v108_v7, %s138_s29 }
  0x13   :  { %55 = vrot.lane.b32.xlu2 %v109_v8, %s139_s3 }
  0x1a   :  { %61 = vrot.lane.b32.xlu0 %v110_v9, %s140_s8  ;;  %67 = vrot.lane.b32.xlu1 %v111_v10, %s141_s9 }
  0x1b   :  { %73 = vrot.lane.b32.xlu2 %v112_v11, %s142_s12 }
  0x22   :  { %79 = vrot.lane.b32.xlu0 %v113_v12, %s143_s17  ;;  %85 = vrot.lane.b32.xlu1 %v114_v13, %s144_s18 }
  0x23   :  { %91 = vrot.lane.b32.xlu2 %v115_v14, %s145_s21 }
  0x5d   :  { %v32_v16 = vpop.permute.xlu2 %31  }
  0x65   :  { %v38_v17 = vpop.permute.xlu2 %37  }
  0x6d   :  { %v56_v18 = vpop.permute.xlu2 %55  }
  0x74   :  { %v8_v19 = vpop.permute.xlu0 %7   ;;  %v20_v20 = vpop.permute.xlu1 %19  }
  0x75   :  { %10 = vst.msk [vmem:[#allocation0] sm:$0x1] %vm9_vm1, %v8_v19   ;;  %v74_v21 = vpop.permute.xlu2 %73  }
  0x7c   :  { %v14_v22 = vpop.permute.xlu0 %13   ;;  %v26_v23 = vpop.permute.xlu1 %25  }
  0x7d   :  { %16 = vst.msk [vmem:[#allocation0] sm:$0x1] %vm15_vm2, %v14_v22   ;;  %v92_v24 = vpop.permute.xlu2 %91  }
  0x7e   :  { %22 = vst.msk [vmem:[#allocation0] sm:$0x1] %vm21_vm3, %v20_v20  }
  0x7f   :  { %28 = vst.msk [vmem:[#allocation0] sm:$0x1] %vm27_vm4, %v26_v23  }
  0x80   :  { %34 = vst.msk [vmem:[#allocation0] sm:$0x1] %vm33_vm5, %v32_v16  }
  0x81   :  { %40 = vst.msk [vmem:[#allocation0] sm:$0x1] %vm39_vm6, %v38_v17  }
  0x84   :  { %v44_v25 = vpop.permute.xlu0 %43   ;;  %v50_v26 = vpop.permute.xlu1 %49  }
  0x85   :  { %46 = vst.msk [vmem:[#allocation0] sm:$0x1] %vm45_vm7, %v44_v25  }
  0x86   :  { %52 = vst.msk [vmem:[#allocation0] sm:$0x1] %vm51_vm8, %v50_v26  }
  0x87   :  { %58 = vst.msk [vmem:[#allocation0] sm:$0x1] %vm57_vm9, %v56_v18  }
  0x8c   :  { %v62_v27 = vpop.permute.xlu0 %61   ;;  %v68_v28 = vpop.permute.xlu1 %67  }
  0x8d   :  { %64 = vst.msk [vmem:[#allocation0] sm:$0x1] %vm63_vm10, %v62_v27  }
  0x8e   :  { %70 = vst.msk [vmem:[#allocation0] sm:$0x1] %vm69_vm11, %v68_v28  }
  0x8f   :  { %76 = vst.msk [vmem:[#allocation0] sm:$0x1] %vm75_vm12, %v74_v21  }
  0x94   :  { %v80_v29 = vpop.permute.xlu0 %79   ;;  %v86_v30 = vpop.permute.xlu1 %85  }
  0x95   :  { %82 = vst.msk [vmem:[#allocation0] sm:$0x1] %vm81_vm13, %v80_v29  }
  0x96   :  { %88 = vst.msk [vmem:[#allocation0] sm:$0x1] %vm87_vm14, %v86_v30  }
  0x97   :  { %94 = vst.msk [vmem:[#allocation0] sm:$0x1] %vm93_vm15, %v92_v24  }
  0x9e   :  { %v97_v31 = vld [vmem:[#allocation0] sm:$0x1] }
  0x9f   :  { %100 = vst [vmem:[%s208_s1] sm:$0x1] %v97_v31 }

// kernel: conv_stem_forward.9
= control target key start
LH: loop header
LB: loop body
LE: loop exit
PB: predicated region body
PF: predicated region fallthrough
CT: control target
= control target key end

     0   :  { %s114_s0 = inlined_call_operand.vmem [shape: bf16[32,128], index: 0, kind: input, shape index: {}]   ;;  %s115_s1 = inlined_call_operand.vmem [shape: f32[1,128], index: 1, kind: input, shape index: {}]   ;;  %s116_s2 = inlined_call_operand.vmem [shape: f32[1,128], index: 2, kind: input, shape index: {}]   ;;  %s117_s3 = inlined_call_operand.vmem [shape: bf16[32,128], index: 3, kind: output, shape index: {}]  }
   0x1   :  { %v55_v0 = vld [vmem:[%s114_s0] sm:$0xff]   ;;  %v72_v5 = vld [vmem:[%s114_s0 + $0x8] sm:$0xff]  }
   0x2   :  { %v74_v1 = vld [vmem:[%s115_s1] ss:$0 sm:$0xff]  ;;  %v56_v2 = vunpack.c.l.bf16 %v55_v0  ;;  %v57_v3 = vunpack.c.h.bf16 %v55_v0  ;;  %v60_v6 = vunpack.c.l.bf16 %v72_v5  ;;  %v61_v7 = vunpack.c.h.bf16 %v72_v5 }
   0x3   :  { %v75_v4 = vld [vmem:[%s116_s2] ss:$0 sm:$0xff] }
   0x4   :  { %v26_v8 = vmul.f32 %v74_v1, %v56_v2  ;;  %v27_v9 = vmul.f32 %v74_v1, %v57_v3  ;;  %v28_v10 = vmul.f32 %v74_v1, %v60_v6  ;;  %v29_v11 = vmul.f32 %v74_v1, %v61_v7 }
   0x6   :  { %v34_v12 = vadd.f32 %v75_v4, %v26_v8  ;;  %v35_v13 = vadd.f32 %v75_v4, %v27_v9  ;;  %v36_v14 = vadd.f32 %v75_v4, %v28_v10  ;;  %v37_v15 = vadd.f32 %v75_v4, %v29_v11 }
   0x8   :  { %v38_v16 = vmax.f32 %v34_v12, 0.0  ;;  %v39_v17 = vmax.f32 %v35_v13, 0.0  ;;  %v40_v18 = vmax.f32 %v36_v14, 0.0  ;;  %v41_v19 = vmax.f32 %v37_v15, 0.0 }
   0xa   :  { %v65_v20 = vpack.c.bf16 %v39_v17, %v38_v16  ;;  %v70_v21 = vpack.c.bf16 %v41_v19, %v40_v18 }
   0xc   :  { %66 = vst [vmem:[%s117_s3] sm:$0xff] %v65_v20  }
   0xd   :  { %73 = vst [vmem:[%s117_s3 + $0x8] sm:$0xff] %v70_v21  }

// kernel: conv_stem_forward.8
= control target key start
LH: loop header
LB: loop body
LE: loop exit
PB: predicated region body
PF: predicated region fallthrough
CT: control target
= control target key end

     0   :  { %s1172_s15 = smov 0   ;;  %s1174_s16 = smov 0   ;;  %s1621_s0 = inlined_call_operand.vmem [shape: bf16[2,1,256,27], index: 0, kind: input, shape index: {}]   ;;  %s1622_s1 = inlined_call_operand.vmem [shape: bf16[1,27,8], index: 1, kind: input, shape index: {}]   ;;  %s1623_s2 = inlined_call_operand.vmem [shape: bf16[2,256,8], index: 2, kind: output, shape index: {0}]   ;;  %s1624_s3 = inlined_call_operand.vmem [shape: f32[2,1,1,8], index: 3, kind: output, shape index: {1}]   ;;  %s1625_s4 = inlined_call_operand.vmem [shape: f32[2,1,1,8], index: 4, kind: output, shape index: {2}]  }
   0x1   :  { %s1176_s17 = smov 0  }
   0x2 LB: > { %s27_s18 = sadd.s32 1, %s1140_s16  ;;  %p976_p0 = scmp.ge.s32.totalorder %s1144_s17, 1  ;;  %s1144_s17 = sphi %s1176_s17, %s15_s17   ;;  %s1140_s16 = sphi %s1174_s16, %s1627_s16   ;;  %s1136_s15 = sphi %s1172_s15, %s1626_s15  }
   0x3   : > { %p29_p1 = scmp.ge.s32.totalorder %s27_s18, 2  ;;  %p192_p2 = scmp.lt.s32.totalorder %s1144_s17, 3 }
   0x5   : > { %s1629_s18 = smov (%p29_p1, %s27_s18), 0  ;;  %p193_p3 = pnand %p976_p0, %p192_p2 }
   0x6   : > { %p239_p4 = scmp.lt.s32.totalorder (!%p193_p3), %s1136_s15, 1 }
   0x7   : > { %196 = sbr.rel (%p193_p3) target bundleno = 352 (0x160), region = 28 }
   0xc   : > { %v1051_v0 = vld [vmem:[%s1622_s1 + $0x8] sm:$0xf]  ;;  %v1090_v1 = vld [vmem:[%s1622_s1 + $0x8] sm:$0x30]  ;;  %vm447_vm0 = vcmask 1044480   ;;  %vm448_vm1 = vcmask 1045504  }
   0xd   : > { %v1052_v2 = vor.u32 %v1090_v1, %v1051_v0  ;;  %v1146_v3 = vmov 65535   ;;  %s1631_s15 = smov (!%p239_p4, %s1136_s15), 1  ;;  %v1089_v7 = vld [vmem:[%s1622_s1] sm:$0xff]  ;;  %vm398_vm2 = vcmask 220160   ;;  %vm575_vm3 = vcmask 60416  }
   0xe   : > { %v449_v4 = vsel %vm447_vm0, 4294967295, %v1146_v3  ;;  %s1071_s23 = sshll.u32 %s1631_s15, 7  ;;  %vm608_vm4 = vcmask 64512   ;;  %s263_s8 = scalar_lea.vmem %s1624_s3, %s1631_s15  ;;  %vm711_vm5 = vcmask 57344  }
   0xf   : > { %v450_v5 = vsel %vm448_vm1, %v449_v4, 0  ;;  %s1207_s28 = scalar_lea.vmem %s1621_s0, %s1071_s23  ;;  %s1246_s5 = scalar_lea.vmem %s1623_s2, %s1071_s23 }
  0x10   : > { %v452_v6 = vand.u32 %v1052_v2, %v450_v5  ;;  %v1073_v8 = vld [vmem:[%s1207_s28] sm:$0xff]  ;;  %v1074_v12 = vld [vmem:[%s1207_s28 + $0x8] sm:$0xff]  ;;  %v1075_v16 = vld [vmem:[%s1207_s28 + $0x10] sm:$0xff]  ;;  %s269_s11 = scalar_lea.vmem %s1625_s4, %s1631_s15 }
  0x11   : > { %v1077_v9 = vld [vmem:[%s1207_s28 + $0x20] sm:$0xff]  ;;  %v1078_v13 = vld [vmem:[%s1207_s28 + $0x28] sm:$0xff]  ;;  %v1079_v17 = vld [vmem:[%s1207_s28 + $0x30] sm:$0xff] }
  0x12   : > { %460 = vmatpush.bf16.msra.mxu0 %v452_v6  ;;  %1091 = vmatpush.bf16.msra.mxu1 %v452_v6  ;;  %v1081_v10 = vld [vmem:[%s1207_s28 + $0x40] sm:$0xff]  ;;  %v1082_v14 = vld [vmem:[%s1207_s28 + $0x48] sm:$0xff]  ;;  %v1083_v18 = vld [vmem:[%s1207_s28 + $0x50] sm:$0xff] }
  0x13   : > { %1092 = vmatpush.bf16.msra.mxu2 %v452_v6  ;;  %1093 = vmatpush.bf16.msra.mxu3 %v452_v6  ;;  %v1085_v11 = vld [vmem:[%s1207_s28 + $0x60] sm:$0xff]  ;;  %v1086_v15 = vld [vmem:[%s1207_s28 + $0x68] sm:$0xff]  ;;  %v1087_v19 = vld [vmem:[%s1207_s28 + $0x70] sm:$0xff] }
  0x14   : > { %v1076_v20 = vld [vmem:[%s1207_s28 + $0x18] sm:$0xff] }
  0x15   : > { %v1080_v21 = vld [vmem:[%s1207_s28 + $0x38] sm:$0xff] }
  0x16   : > { %461 = vmatpush.bf16.msra.mxu0 %v1089_v7  ;;  %1094 = vmatpush.bf16.msra.mxu1 %v1089_v7  ;;  %v1084_v22 = vld [vmem:[%s1207_s28 + $0x58] sm:$0xff] }
  0x17   : > { %1095 = vmatpush.bf16.msra.mxu2 %v1089_v7  ;;  %1096 = vmatpush.bf16.msra.mxu3 %v1089_v7  ;;  %v1088_v23 = vld [vmem:[%s1207_s28 + $0x78] sm:$0xff] }
  0x19   : > { %1053 = vmatmul.msk.bf16.vlgmr.msra.gmra.mxu0 %vm398_vm2, %v1073_v8  ;;  %1057 = vmatmul.msk.bf16.vlgmr.msra.gmra.mxu1 %vm398_vm2, %v1077_v9 }
  0x1a   : > { %1061 = vmatmul.msk.bf16.vlgmr.msra.gmra.mxu2 %vm398_vm2, %v1081_v10  ;;  %1065 = vmatmul.msk.bf16.vlgmr.msra.gmra.mxu3 %vm398_vm2, %v1085_v11 }
  0x29   : > { %1054 = vmatmul.msk.bf16.gmra.mxu0 %vm398_vm2, %v1074_v12  ;;  %1058 = vmatmul.msk.bf16.gmra.mxu1 %vm398_vm2, %v1078_v13 }
  0x2a   : > { %1062 = vmatmul.msk.bf16.gmra.mxu2 %vm398_vm2, %v1082_v14  ;;  %1066 = vmatmul.msk.bf16.gmra.mxu3 %vm398_vm2, %v1086_v15 }
  0x39   : > { %1055 = vmatmul.msk.bf16.gmra.mxu0 %vm398_vm2, %v1075_v16  ;;  %1059 = vmatmul.msk.bf16.gmra.mxu1 %vm398_vm2, %v1079_v17 }
  0x3a   : > { %1063 = vmatmul.msk.bf16.gmra.mxu2 %vm398_vm2, %v1083_v18  ;;  %1067 = vmatmul.msk.bf16.gmra.mxu3 %vm398_vm2, %v1087_v19 }
  0x49   : > { %1056 = vmatmul.msk.bf16.gmra.mxu0 %vm398_vm2, %v1076_v20  ;;  %1060 = vmatmul.msk.bf16.gmra.mxu1 %vm398_vm2, %v1080_v21 }
  0x4a   : > { %1064 = vmatmul.msk.bf16.gmra.mxu2 %vm398_vm2, %v1084_v22  ;;  %1068 = vmatmul.msk.bf16.gmra.mxu3 %vm398_vm2, %v1088_v23 }
  0x96   : > { %v1248_v24 = vpop.f32.mrf.mxu0  ;;  %v1250_v25 = vpop.f32.mrf.mxu1 }
  0x97   : > { %v543_v26 = vpack.c.bf16 %v1248_v24, %v1248_v24  ;;  %v551_v27 = vpack.c.bf16 %v1250_v25, %v1250_v25  ;;  %v609_v4 = vsel %vm608_vm4, %v1248_v24, 0.0 }
  0x99   : > { %576 = vst.msk [vmem:[%s1246_s5] sm:$0xf] %vm575_vm3, %v543_v26 }
  0x9a   : > { %584 = vst.msk [vmem:[%s1246_s5 + $0x20] sm:$0xf] %vm575_vm3, %v551_v27 }
  0x9d   : > { %v1260_v28 = vpop.f32.mrf.mxu2  ;;  %v1272_v34 = vpop.f32.mrf.mxu3 }
  0x9e   : > { %v1262_v29 = vpop.f32.mrf.mxu0  ;;  %v1264_v30 = vpop.f32.mrf.mxu1  ;;  %v559_v31 = vpack.c.bf16 %v1260_v28, %v1260_v28  ;;  %v567_v35 = vpack.c.bf16 %v1272_v34, %v1272_v34 }
  0x9f   : > { %v544_v32 = vpack.c.bf16 %v1262_v29, %v1262_v29  ;;  %v552_v33 = vpack.c.bf16 %v1264_v30, %v1264_v30  ;;  %v610_v3 = vsel %vm608_vm4, %v1262_v29, 0.0 }
  0xa0   : > { %592 = vst.msk [vmem:[%s1246_s5 + $0x40] sm:$0xf] %vm575_vm3, %v559_v31  ;;  %v611_v6 = vadd.f32 %v610_v3, %v609_v4 }
  0xa1   : > { %577 = vst.msk [vmem:[%s1246_s5 + $0x4] sm:$0xf] %vm575_vm3, %v544_v32 }
  0xa2   : > { %585 = vst.msk [vmem:[%s1246_s5 + $0x24] sm:$0xf] %vm575_vm3, %v552_v33 }
  0xa3   : > { %600 = vst.msk [vmem:[%s1246_s5 + $0x60] sm:$0xf] %vm575_vm3, %v567_v35 }
  0xa5   : > { %v1284_v36 = vpop.f32.mrf.mxu2  ;;  %v1296_v42 = vpop.f32.mrf.mxu3 }
  0xa6   : > { %v1286_v37 = vpop.f32.mrf.mxu0  ;;  %v1288_v38 = vpop.f32.mrf.mxu1  ;;  %v560_v39 = vpack.c.bf16 %v1284_v36, %v1284_v36  ;;  %v568_v43 = vpack.c.bf16 %v1296_v42, %v1296_v42 }
  0xa7   : > { %v545_v40 = vpack.c.bf16 %v1286_v37, %v1286_v37  ;;  %v553_v41 = vpack.c.bf16 %v1288_v38, %v1288_v38  ;;  %v612_v5 = vsel %vm608_vm4, %v1286_v37, 0.0 }
  0xa8   : > { %593 = vst.msk [vmem:[%s1246_s5 + $0x44] sm:$0xf] %vm575_vm3, %v560_v39  ;;  %v613_v9 = vadd.f32 %v612_v5, %v611_v6 }
  0xa9   : > { %578 = vst.msk [vmem:[%s1246_s5 + $0x8] sm:$0xf] %vm575_vm3, %v545_v40 }
  0xaa   : > { %586 = vst.msk [vmem:[%s1246_s5 + $0x28] sm:$0xf] %vm575_vm3, %v553_v41 }
  0xab   : > { %601 = vst.msk [vmem:[%s1246_s5 + $0x64] sm:$0xf] %vm575_vm3, %v568_v43 }
  0xad   : > { %v1308_v44 = vpop.f32.mrf.mxu2  ;;  %v1320_v50 = vpop.f32.mrf.mxu3 }
  0xae   : > { %v1310_v45 = vpop.f32.mrf.mxu0  ;;  %v1312_v46 = vpop.f32.mrf.mxu1  ;;  %v561_v47 = vpack.c.bf16 %v1308_v44, %v1308_v44  ;;  %v569_v58 = vpack.c.bf16 %v1320_v50, %v1320_v50 }
  0xaf   : > { %v546_v48 = vpack.c.bf16 %v1310_v45, %v1310_v45  ;;  %v554_v49 = vpack.c.bf16 %v1312_v46, %v1312_v46  ;;  %v614_v7 = vsel %vm608_vm4, %v1310_v45, 0.0 }
  0xb0   : > { %594 = vst.msk [vmem:[%s1246_s5 + $0x48] sm:$0xf] %vm575_vm3, %v561_v47  ;;  %v615_v17 = vadd.f32 %v614_v7, %v613_v9  ;;  %v624_v47 = vsel %vm608_vm4, %v1250_v25, 0.0 }
  0xb1   : > { %579 = vst.msk [vmem:[%s1246_s5 + $0xc] sm:$0xf] %vm575_vm3, %v546_v48 }
  0xb2   : > { %587 = vst.msk [vmem:[%s1246_s5 + $0x2c] sm:$0xf] %vm575_vm3, %v554_v49  ;;  %v626_v49 = vsel %vm608_vm4, %v1264_v30, 0.0 }
  0xb3   : > { %602 = vst.msk [vmem:[%s1246_s5 + $0x68] sm:$0xf] %vm575_vm3, %v569_v58 }
  0xb5   : > { %v1328_v51 = vpop.f32.mrf.mxu2  ;;  %v1340_v57 = vpop.f32.mrf.mxu3 }
  0xb6   : > { %v1330_v52 = vpop.f32.mrf.mxu0  ;;  %v1332_v53 = vpop.f32.mrf.mxu1  ;;  %v562_v54 = vpack.c.bf16 %v1328_v51, %v1328_v51  ;;  %v570_v59 = vpack.c.bf16 %v1340_v57, %v1340_v57 }
  0xb7   : > { %v547_v55 = vpack.c.bf16 %v1330_v52, %v1330_v52  ;;  %v555_v56 = vpack.c.bf16 %v1332_v53, %v1332_v53  ;;  %v616_v13 = vsel %vm608_vm4, %v1330_v52, 0.0  ;;  %v632_v5 = vsel %vm608_vm4, %v1332_v53, 0.0 }
  0xb8   : > { %595 = vst.msk [vmem:[%s1246_s5 + $0x4c] sm:$0xf] %vm575_vm3, %v562_v54  ;;  %v617_v21 = vadd.f32 %v616_v13, %v615_v17  ;;  %v640_v17 = vsel %vm608_vm4, %v1260_v28, 0.0 }
  0xb9   : > { %580 = vst.msk [vmem:[%s1246_s5 + $0x10] sm:$0xf] %vm575_vm3, %v547_v55  ;;  %v628_v55 = vsel %vm608_vm4, %v1288_v38, 0.0 }
  0xba   : > { %588 = vst.msk [vmem:[%s1246_s5 + $0x30] sm:$0xf] %vm575_vm3, %v555_v56 }
  0xbb   : > { %603 = vst.msk [vmem:[%s1246_s5 + $0x6c] sm:$0xf] %vm575_vm3, %v570_v59 }
  0xbd   : > { %v1356_v60 = vpop.f32.mrf.mxu2  ;;  %v1368_v2 = vpop.f32.mrf.mxu3 }
  0xbe   : > { %v1358_v61 = vpop.f32.mrf.mxu0  ;;  %v1360_v62 = vpop.f32.mrf.mxu1  ;;  %v563_v63 = vpack.c.bf16 %v1356_v60, %v1356_v60  ;;  %v571_v18 = vpack.c.bf16 %v1368_v2, %v1368_v2 }
  0xbf   : > { %v548_v0 = vpack.c.bf16 %v1358_v61, %v1358_v61  ;;  %v556_v1 = vpack.c.bf16 %v1360_v62, %v1360_v62  ;;  %v618_v20 = vsel %vm608_vm4, %v1358_v61, 0.0  ;;  %v634_v7 = vsel %vm608_vm4, %v1360_v62, 0.0 }
  0xc0   : > { %596 = vst.msk [vmem:[%s1246_s5 + $0x50] sm:$0xf] %vm575_vm3, %v563_v63  ;;  %v619_v23 = vadd.f32 %v618_v20, %v617_v21  ;;  %v630_v63 = vsel %vm608_vm4, %v1312_v46, 0.0  ;;  %v644_v21 = vsel %vm608_vm4, %v1308_v44, 0.0 }
  0xc1   : > { %581 = vst.msk [vmem:[%s1246_s5 + $0x14] sm:$0xf] %vm575_vm3, %v548_v0 }
  0xc2   : > { %589 = vst.msk [vmem:[%s1246_s5 + $0x34] sm:$0xf] %vm575_vm3, %v556_v1 }
  0xc3   : > { %604 = vst.msk [vmem:[%s1246_s5 + $0x70] sm:$0xf] %vm575_vm3, %v571_v18 }
  0xc5   : > { %v1384_v8 = vpop.f32.mrf.mxu2  ;;  %v1398_v16 = vpop.f32.mrf.mxu3 }
  0xc6   : > { %v1386_v10 = vpop.f32.mrf.mxu0  ;;  %v1388_v11 = vpop.f32.mrf.mxu1  ;;  %v564_v12 = vpack.c.bf16 %v1384_v8, %v1384_v8  ;;  %v572_v19 = vpack.c.bf16 %v1398_v16, %v1398_v16 }
  0xc7   : > { %v549_v14 = vpack.c.bf16 %v1386_v10, %v1386_v10  ;;  %v557_v15 = vpack.c.bf16 %v1388_v11, %v1388_v11  ;;  %v620_v22 = vsel %vm608_vm4, %v1386_v10, 0.0 }
  0xc8   : > { %597 = vst.msk [vmem:[%s1246_s5 + $0x54] sm:$0xf] %vm575_vm3, %v564_v12  ;;  %v621_v27 = vadd.f32 %v620_v22, %v619_v23  ;;  %v636_v12 = vsel %vm608_vm4, %v1388_v11, 0.0  ;;  %v646_v23 = vsel %vm608_vm4, %v1328_v51, 0.0 }
  0xc9   : > { %582 = vst.msk [vmem:[%s1246_s5 + $0x18] sm:$0xf] %vm575_vm3, %v549_v14 }
  0xca   : > { %590 = vst.msk [vmem:[%s1246_s5 + $0x38] sm:$0xf] %vm575_vm3, %v557_v15 }
  0xcb   : > { %605 = vst.msk [vmem:[%s1246_s5 + $0x74] sm:$0xf] %vm575_vm3, %v572_v19  ;;  %v642_v19 = vsel %vm608_vm4, %v1284_v36, 0.0 }
  0xcd   : > { %v1418_v26 = vpop.f32.mrf.mxu2  ;;  %v1432_v41 = vpop.f32.mrf.mxu3 }
  0xce   : > { %v1420_v31 = vpop.f32.mrf.mxu0  ;;  %v1422_v32 = vpop.f32.mrf.mxu1  ;;  %v565_v33 = vpack.c.bf16 %v1418_v26, %v1418_v26  ;;  %v573_v0 = vpack.c.bf16 %v1432_v41, %v1432_v41 }
  0xcf   : > { %v550_v35 = vpack.c.bf16 %v1420_v31, %v1420_v31  ;;  %v622_v39 = vsel %vm608_vm4, %v1420_v31, 0.0  ;;  %v558_v40 = vpack.c.bf16 %v1422_v32, %v1422_v32  ;;  %v638_v14 = vsel %vm608_vm4, %v1422_v32, 0.0 }
  0xd0   : > { %v623_v43 = vadd.f32 %v622_v39, %v621_v27  ;;  %598 = vst.msk [vmem:[%s1246_s5 + $0x58] sm:$0xf] %vm575_vm3, %v565_v33  ;;  %v648_v33 = vsel %vm608_vm4, %v1356_v60, 0.0  ;;  %v650_v39 = vsel %vm608_vm4, %v1384_v8, 0.0 }
  0xd1   : > { %583 = vst.msk [vmem:[%s1246_s5 + $0x1c] sm:$0xf] %vm575_vm3, %v550_v35 }
  0xd2   : > { %v625_v48 = vadd.f32 %v624_v47, %v623_v43  ;;  %591 = vst.msk [vmem:[%s1246_s5 + $0x3c] sm:$0xf] %vm575_vm3, %v558_v40  ;;  %v652_v43 = vsel %vm608_vm4, %v1418_v26, 0.0 }
  0xd3   : > { %606 = vst.msk [vmem:[%s1246_s5 + $0x78] sm:$0xf] %vm575_vm3, %v573_v0 }
  0xd4   : > { %v627_v54 = vadd.f32 %v626_v49, %v625_v48 }
  0xd5   : > { %v1446_v56 = vpop.f32.mrf.mxu2  ;;  %v1454_v1 = vpop.f32.mrf.mxu3 }
  0xd6   : > { %v629_v58 = vadd.f32 %v628_v55, %v627_v54  ;;  %v566_v59 = vpack.c.bf16 %v1446_v56, %v1446_v56  ;;  %v574_v4 = vpack.c.bf16 %v1454_v1, %v1454_v1  ;;  %v654_v48 = vsel %vm608_vm4, %v1446_v56, 0.0 }
  0xd7   : > { %v656_v54 = vsel %vm608_vm4, %v1272_v34, 0.0 }
  0xd8   : > { %v631_v3 = vadd.f32 %v630_v63, %v629_v58  ;;  %599 = vst.msk [vmem:[%s1246_s5 + $0x5c] sm:$0xf] %vm575_vm3, %v566_v59  ;;  %v658_v58 = vsel %vm608_vm4, %v1296_v42, 0.0  ;;  %v660_v63 = vsel %vm608_vm4, %v1320_v50, 0.0 }
  0xd9   : > { %607 = vst.msk [vmem:[%s1246_s5 + $0x7c] sm:$0xf] %vm575_vm3, %v574_v4 }
  0xda   : > { %v633_v6 = vadd.f32 %v632_v5, %v631_v3  ;;  %v662_v3 = vsel %vm608_vm4, %v1340_v57, 0.0  ;;  %v664_v5 = vsel %vm608_vm4, %v1368_v2, 0.0 }
  0xdc   : > { %v635_v9 = vadd.f32 %v634_v7, %v633_v6  ;;  %v666_v7 = vsel %vm608_vm4, %v1398_v16, 0.0 }
  0xde   : > { %v637_v13 = vadd.f32 %v636_v12, %v635_v9  ;;  %v668_v12 = vsel %vm608_vm4, %v1432_v41, 0.0 }
  0xe0   : > { %v639_v15 = vadd.f32 %v638_v14, %v637_v13  ;;  %v670_v14 = vsel %vm608_vm4, %v1454_v1, 0.0 }
  0xe2   : > { %v641_v18 = vadd.f32 %v640_v17, %v639_v15 }
  0xe4   : > { %v643_v20 = vadd.f32 %v642_v19, %v641_v18 }
  0xe6   : > { %v645_v22 = vadd.f32 %v644_v21, %v643_v20 }
  0xe8   : > { %v647_v27 = vadd.f32 %v646_v23, %v645_v22 }
  0xea   : > { %v649_v35 = vadd.f32 %v648_v33, %v647_v27 }
  0xec   : > { %v651_v40 = vadd.f32 %v650_v39, %v649_v35 }
  0xee   : > { %v653_v47 = vadd.f32 %v652_v43, %v651_v40 }
  0xf0   : > { %v655_v49 = vadd.f32 %v654_v48, %v653_v47 }
  0xf2   : > { %v657_v55 = vadd.f32 %v656_v54, %v655_v49 }
  0xf4   : > { %v659_v59 = vadd.f32 %v658_v58, %v657_v55 }
  0xf6   : > { %v661_v0 = vadd.f32 %v660_v63, %v659_v59 }
  0xf8   : > { %v663_v4 = vadd.f32 %v662_v3, %v661_v0 }
  0xfa   : > { %v665_v6 = vadd.f32 %v664_v5, %v663_v4 }
  0xfc   : > { %v667_v9 = vadd.f32 %v666_v7, %v665_v6 }
  0xfe   : > { %v669_v13 = vadd.f32 %v668_v12, %v667_v9 }
 0x100   : > { %v671_v15 = vadd.f32 %v670_v14, %v669_v13 }
 0x102   : > { %v672_v17 = vrot.slane %v671_v15, 4 }
 0x104   : > { %v673_v18 = vadd.f32 %v672_v17, %v671_v15 }
 0x106   : > { %v674_v19 = vrot.slane %v673_v18, 2 }
 0x108   : > { %v675_v20 = vadd.f32 %v674_v19, %v673_v18 }
 0x10a   : > { %v676_v21 = vrot.slane %v675_v20, 1 }
 0x10c   : > { %v677_v22 = vadd.f32 %v676_v21, %v675_v20 }
 0x10e   : > { %712 = vst.msk [vmem:[%s263_s8] sm:$0x1] %vm711_vm5, %v677_v22  ;;  %v1509_v23 = vmul.f32 0.00390625, %v677_v22 }
 0x110   : > { %v679_v27 = vsub.f32 %v1248_v24, %v1509_v23  ;;  %v680_v33 = vsub.f32 %v1262_v29, %v1509_v23  ;;  %v681_v35 = vsub.f32 %v1286_v37, %v1509_v23  ;;  %v682_v39 = vsub.f32 %v1310_v45, %v1509_v23 }
 0x111   : > { %v683_v47 = vsub.f32 %v1330_v52, %v1509_v23  ;;  %v684_v49 = vsub.f32 %v1358_v61, %v1509_v23  ;;  %v685_v37 = vsub.f32 %v1386_v10, %v1509_v23  ;;  %v686_v52 = vsub.f32 %v1420_v31, %v1509_v23 }
 0x112   : > { %v713_v40 = vmul.f32 %v679_v27, %v679_v27  ;;  %v714_v43 = vmul.f32 %v680_v33, %v680_v33  ;;  %v715_v48 = vmul.f32 %v681_v35, %v681_v35  ;;  %v716_v54 = vmul.f32 %v682_v39, %v682_v39 }
 0x113   : > { %v717_v58 = vmul.f32 %v683_v47, %v683_v47  ;;  %v718_v63 = vmul.f32 %v684_v49, %v684_v49  ;;  %v687_v3 = vsub.f32 %v1250_v25, %v1509_v23  ;;  %v719_v4 = vmul.f32 %v685_v37, %v685_v37 }
 0x114   : > { %v745_v24 = vsel %vm608_vm4, %v713_v40, 0.0  ;;  %v746_v29 = vsel %vm608_vm4, %v714_v43, 0.0  ;;  %v748_v45 = vsel %vm608_vm4, %v715_v48, 0.0  ;;  %v750_v0 = vsel %vm608_vm4, %v716_v54, 0.0 }
 0x115   : > { %v747_v55 = vadd.f32 %v746_v29, %v745_v24  ;;  %v752_v5 = vsel %vm608_vm4, %v717_v58, 0.0  ;;  %v688_v10 = vsub.f32 %v1264_v30, %v1509_v23  ;;  %v720_v7 = vmul.f32 %v686_v52, %v686_v52 }
 0x116   : > { %v754_v9 = vsel %vm608_vm4, %v718_v63, 0.0  ;;  %v689_v31 = vsub.f32 %v1288_v38, %v1509_v23  ;;  %v721_v13 = vmul.f32 %v687_v3, %v687_v3  ;;  %v756_v14 = vsel %vm608_vm4, %v719_v4, 0.0 }
 0x117   : > { %v749_v59 = vadd.f32 %v748_v45, %v747_v55  ;;  %v690_v25 = vsub.f32 %v1312_v46, %v1509_v23  ;;  %v722_v17 = vmul.f32 %v688_v10, %v688_v10  ;;  %v758_v18 = vsel %vm608_vm4, %v720_v7, 0.0 }
 0x118   : > { %v691_v30 = vsub.f32 %v1332_v53, %v1509_v23  ;;  %v723_v20 = vmul.f32 %v689_v31, %v689_v31  ;;  %v760_v21 = vsel %vm608_vm4, %v721_v13, 0.0  ;;  %v692_v38 = vsub.f32 %v1360_v62, %v1509_v23 }
 0x119   : > { %v751_v61 = vadd.f32 %v750_v0, %v749_v59  ;;  %v724_v27 = vmul.f32 %v690_v25, %v690_v25  ;;  %v762_v33 = vsel %vm608_vm4, %v722_v17, 0.0  ;;  %v693_v46 = vsub.f32 %v1388_v11, %v1509_v23 }
 0x11a   : > { %v725_v39 = vmul.f32 %v691_v30, %v691_v30  ;;  %v764_v40 = vsel %vm608_vm4, %v723_v20, 0.0  ;;  %v694_v53 = vsub.f32 %v1422_v32, %v1509_v23  ;;  %v726_v47 = vmul.f32 %v692_v38, %v692_v38 }
 0x11b   : > { %v753_v6 = vadd.f32 %v752_v5, %v751_v61  ;;  %v766_v48 = vsel %vm608_vm4, %v724_v27, 0.0  ;;  %v695_v62 = vsub.f32 %v1260_v28, %v1509_v23  ;;  %v727_v54 = vmul.f32 %v693_v46, %v693_v46 }
 0x11c   : > { %v768_v24 = vsel %vm608_vm4, %v725_v39, 0.0  ;;  %v696_v11 = vsub.f32 %v1284_v36, %v1509_v23  ;;  %v728_v55 = vmul.f32 %v694_v53, %v694_v53  ;;  %v770_v37 = vsel %vm608_vm4, %v726_v47, 0.0 }
 0x11d   : > { %v755_v12 = vadd.f32 %v754_v9, %v753_v6  ;;  %v697_v32 = vsub.f32 %v1308_v44, %v1509_v23  ;;  %v729_v45 = vmul.f32 %v695_v62, %v695_v62  ;;  %v772_v59 = vsel %vm608_vm4, %v727_v54, 0.0 }
 0x11e   : > { %v698_v28 = vsub.f32 %v1328_v51, %v1509_v23  ;;  %v730_v63 = vmul.f32 %v696_v11, %v696_v11  ;;  %v774_v0 = vsel %vm608_vm4, %v728_v55, 0.0  ;;  %v699_v36 = vsub.f32 %v1356_v60, %v1509_v23 }
 0x11f   : > { %v757_v15 = vadd.f32 %v756_v14, %v755_v12  ;;  %v731_v3 = vmul.f32 %v697_v32, %v697_v32  ;;  %v776_v4 = vsel %vm608_vm4, %v729_v45, 0.0  ;;  %v700_v44 = vsub.f32 %v1384_v8, %v1509_v23 }
 0x120   : > { %v732_v6 = vmul.f32 %v698_v28, %v698_v28  ;;  %v778_v10 = vsel %vm608_vm4, %v730_v63, 0.0  ;;  %v701_v51 = vsub.f32 %v1418_v26, %v1509_v23  ;;  %v733_v9 = vmul.f32 %v699_v36, %v699_v36 }
 0x121   : > { %v759_v19 = vadd.f32 %v758_v18, %v757_v15  ;;  %v780_v12 = vsel %vm608_vm4, %v731_v3, 0.0  ;;  %v702_v60 = vsub.f32 %v1446_v56, %v1509_v23  ;;  %v734_v13 = vmul.f32 %v700_v44, %v700_v44 }
 0x122   : > { %v782_v14 = vsel %vm608_vm4, %v732_v6, 0.0  ;;  %v703_v8 = vsub.f32 %v1272_v34, %v1509_v23  ;;  %v735_v25 = vmul.f32 %v701_v51, %v701_v51  ;;  %v784_v17 = vsel %vm608_vm4, %v733_v9, 0.0 }
 0x123   : > { %v761_v22 = vadd.f32 %v760_v21, %v759_v19  ;;  %v704_v26 = vsub.f32 %v1296_v42, %v1509_v23  ;;  %v736_v19 = vmul.f32 %v702_v60, %v702_v60  ;;  %v786_v30 = vsel %vm608_vm4, %v734_v13, 0.0 }
 0x124   : > { %v705_v56 = vsub.f32 %v1320_v50, %v1509_v23  ;;  %v737_v21 = vmul.f32 %v703_v8, %v703_v8  ;;  %v706_v34 = vsub.f32 %v1340_v57, %v1509_v23  ;;  %v707_v42 = vsub.f32 %v1368_v2, %v1509_v23 }
 0x125   : > { %v763_v35 = vadd.f32 %v762_v33, %v761_v22  ;;  %v788_v22 = vsel %vm608_vm4, %v735_v25, 0.0  ;;  %v738_v27 = vmul.f32 %v704_v26, %v704_v26  ;;  %v790_v33 = vsel %vm608_vm4, %v736_v19, 0.0 }
 0x126   : > { %v739_v46 = vmul.f32 %v705_v56, %v705_v56  ;;  %v792_v39 = vsel %vm608_vm4, %v737_v21, 0.0  ;;  %v708_v50 = vsub.f32 %v1398_v16, %v1509_v23  ;;  %v709_v57 = vsub.f32 %v1432_v41, %v1509_v23 }
 0x127   : > { %v765_v43 = vadd.f32 %v764_v40, %v763_v35  ;;  %v794_v53 = vsel %vm608_vm4, %v738_v27, 0.0  ;;  %v710_v2 = vsub.f32 %v1454_v1, %v1509_v23 }
 0x128   : > { %v742_v54 = vmul.f32 %v708_v50, %v708_v50  ;;  %v743_v16 = vmul.f32 %v709_v57, %v709_v57 }
 0x129   : > { %v767_v49 = vadd.f32 %v766_v48, %v765_v43  ;;  %v740_v43 = vmul.f32 %v706_v34, %v706_v34  ;;  %v741_v48 = vmul.f32 %v707_v42, %v707_v42 }
 0x12a   : > { %v804_v32 = vsel %vm608_vm4, %v743_v16, 0.0 }
 0x12b   : > { %v769_v29 = vadd.f32 %v768_v24, %v767_v49  ;;  %v796_v49 = vsel %vm608_vm4, %v739_v46, 0.0  ;;  %v798_v24 = vsel %vm608_vm4, %v740_v43, 0.0  ;;  %v800_v11 = vsel %vm608_vm4, %v741_v48, 0.0 }
 0x12d   : > { %v771_v58 = vadd.f32 %v770_v37, %v769_v29  ;;  %v744_v37 = vmul.f32 %v710_v2, %v710_v2 }
 0x12f   : > { %v773_v52 = vadd.f32 %v772_v59, %v771_v58  ;;  %v802_v58 = vsel %vm608_vm4, %v742_v54, 0.0  ;;  %v806_v59 = vsel %vm608_vm4, %v744_v37, 0.0 }
 0x131   : > { %v775_v61 = vadd.f32 %v774_v0, %v773_v52 }
 0x133   : > { %v777_v5 = vadd.f32 %v776_v4, %v775_v61 }
 0x135   : > { %v779_v7 = vadd.f32 %v778_v10, %v777_v5 }
 0x137   : > { %v781_v31 = vadd.f32 %v780_v12, %v779_v7 }
 0x139   : > { %v783_v15 = vadd.f32 %v782_v14, %v781_v31 }
 0x13b   : > { %v785_v18 = vadd.f32 %v784_v17, %v783_v15 }
 0x13d   : > { %v787_v20 = vadd.f32 %v786_v30, %v785_v18 }
 0x13f   : > { %v789_v38 = vadd.f32 %v788_v22, %v787_v20 }
 0x141   : > { %v791_v35 = vadd.f32 %v790_v33, %v789_v38 }
 0x143   : > { %v793_v40 = vadd.f32 %v792_v39, %v791_v35 }
 0x145   : > { %v795_v47 = vadd.f32 %v794_v53, %v793_v40 }
 0x147   : > { %v797_v62 = vadd.f32 %v796_v49, %v795_v47 }
 0x149   : > { %v799_v29 = vadd.f32 %v798_v24, %v797_v62 }
 0x14b   : > { %v801_v55 = vadd.f32 %v800_v11, %v799_v29 }
 0x14d   : > { %v803_v41 = vadd.f32 %v802_v58, %v801_v55 }
 0x14f   : > { %v805_v45 = vadd.f32 %v804_v32, %v803_v41 }
 0x151   : > { %v807_v52 = vadd.f32 %v806_v59, %v805_v45 }
 0x153   : > { %v808_v1 = vrot.slane %v807_v52, 4 }
 0x155   : > { %v809_v23 = vadd.f32 %v808_v1, %v807_v52 }
 0x157   : > { %v810_v28 = vrot.slane %v809_v23, 2 }
 0x159   : > { %v811_v63 = vadd.f32 %v810_v28, %v809_v23 }
 0x15b   : > { %v812_v0 = vrot.slane %v811_v63, 1 }
 0x15d   : > { %v813_v61 = vadd.f32 %v812_v0, %v811_v63 }
 0x15f   : > { %814 = vst.msk [vmem:[%s269_s11] sm:$0x1] %vm711_vm5, %v813_v61 }
 0x160 PF: > { %s15_s17 = sadd.s32 1, %s1144_s17   ;;  %s1626_s15 = smov %s1140_s16 }
 0x161   : > { %p12_p5 = scmp.ge.s32.totalorder %s15_s17, 4   ;;  %s1627_s16 = smov %s1629_s18 }
 0x163   :  { %14 = sbr.rel (!%p12_p5) target bundleno = 2 (0x2), region = 82 }

// kernel: tile.43
= control target key start
LH: loop header
LB: loop body
LE: loop exit
PB: predicated region body
PF: predicated region fallthrough
CT: control target
= control target key end

     0   :  { %s22_s0 = inlined_call_operand.vmem [shape: f32[16], index: 0, kind: input, shape index: {}]   ;;  %s23_s1 = inlined_call_operand.vmem [shape: f32[8,16], index: 1, kind: output, shape index: {}]  }
   0x1   :  { %v4_v0 = vld [vmem:[%s22_s0] ss:$0 sm:$0xff] }
   0x2   :  { %5 = vst [vmem:[%s23_s1] sm:$0xff] %v4_v0 }

// kernel: tile.44
= control target key start
LH: loop header
LB: loop body
LE: loop exit
PB: predicated region body
PF: predicated region fallthrough
CT: control target
= control target key end

     0   :  { %s67_s10 = smov 112   ;;  %s68_s11 = smov 80   ;;  %vm3_vm0 = vcmask 130048   ;;  %vm9_vm1 = vcmask 1048448   ;;  %vm15_vm2 = vcmask 917248   ;;  %vm21_vm3 = vcmask 786048   ;;  %s111_s0 = inlined_call_operand.vmem [shape: f32[8,16], index: 0, kind: input, shape index: {}]   ;;  %s112_s1 = inlined_call_operand.vmem [shape: f32[1,128], index: 1, kind: output, shape index: {}]  }
   0x1   :  { %v53_v0 = vld [vmem:[%s111_s0 + $0x7] sm:$0x1]   ;;  %v55_v1 = vld [vmem:[%s111_s0 + $0x5] sm:$0x1]   ;;  %v57_v2 = vld [vmem:[%s111_s0 + $0x3] sm:$0x1]  }
   0x2   :  { %7 = vrot.lane.b32.xlu0 %v53_v0, %s67_s10  ;;  %19 = vrot.lane.b32.xlu1 %v55_v1, %s68_s11  ;;  %s69_s14 = smov 48   ;;  %v54_v3 = vld [vmem:[%s111_s0 + $0x6] sm:$0x1]   ;;  %v56_v4 = vld [vmem:[%s111_s0 + $0x4] sm:$0x1]   ;;  %s70_s21 = smov 96  }
   0x3   :  { %31 = vrot.lane.b32.xlu2 %v57_v2, %s69_s14  ;;  %v58_v5 = vld [vmem:[%s111_s0 + $0x2] sm:$0x1]   ;;  %s71_s22 = smov 64   ;;  %s72_s23 = smov 32   ;;  %v59_v6 = vld [vmem:[%s111_s0 + $0x1] sm:$0x1]  }
   0x4   :  { %s73_s26 = smov 16   ;;  %v2_v7 = vld [vmem:[%s111_s0] sm:$0x1]   ;;  %vm27_vm4 = vcmask 654848   ;;  %vm33_vm5 = vcmask 523648   ;;  %vm39_vm6 = vcmask 392448  }
   0x5   :  { %4 = vst.msk [vmem:[#allocation0] sm:$0x1] %vm3_vm0, %v2_v7   ;;  %vm45_vm7 = vcmask 261248  }
   0xa   :  { %13 = vrot.lane.b32.xlu0 %v54_v3, %s70_s21  ;;  %25 = vrot.lane.b32.xlu1 %v56_v4, %s71_s22 }
   0xb   :  { %37 = vrot.lane.b32.xlu2 %v58_v5, %s72_s23 }
  0x12   :  { %43 = vrot.lane.b32.xlu0 %v59_v6, %s73_s26 }
  0x5d   :  { %v32_v8 = vpop.permute.xlu2 %31  }
  0x65   :  { %v38_v9 = vpop.permute.xlu2 %37  }
  0x74   :  { %v8_v10 = vpop.permute.xlu0 %7   ;;  %v20_v11 = vpop.permute.xlu1 %19  }
  0x75   :  { %10 = vst.msk [vmem:[#allocation0] sm:$0x1] %vm9_vm1, %v8_v10  }
  0x7c   :  { %v14_v12 = vpop.permute.xlu0 %13   ;;  %v26_v13 = vpop.permute.xlu1 %25  }
  0x7d   :  { %16 = vst.msk [vmem:[#allocation0] sm:$0x1] %vm15_vm2, %v14_v12  }
  0x7e   :  { %22 = vst.msk [vmem:[#allocation0] sm:$0x1] %vm21_vm3, %v20_v11  }
  0x7f   :  { %28 = vst.msk [vmem:[#allocation0] sm:$0x1] %vm27_vm4, %v26_v13  }
  0x80   :  { %34 = vst.msk [vmem:[#allocation0] sm:$0x1] %vm33_vm5, %v32_v8  }
  0x81   :  { %40 = vst.msk [vmem:[#allocation0] sm:$0x1] %vm39_vm6, %v38_v9  }
  0x84   :  { %v44_v14 = vpop.permute.xlu0 %43  }
  0x85   :  { %46 = vst.msk [vmem:[#allocation0] sm:$0x1] %vm45_vm7, %v44_v14  }
  0x8c   :  { %v49_v15 = vld [vmem:[#allocation0] sm:$0x1] }
  0x8d   :  { %52 = vst [vmem:[%s112_s1] sm:$0x1] %v49_v15 }

// kernel: conv_stem_forward.10
= control target key start
LH: loop header
LB: loop body
LE: loop exit
PB: predicated region body
PF: predicated region fallthrough
CT: control target
= control target key end

     0   :  { %s763_s15 = smov 0   ;;  %s765_s16 = smov 0   ;;  %s858_s0 = inlined_call_operand.vmem [shape: bf16[2,1,64,72], index: 0, kind: input, shape index: {}]   ;;  %s859_s1 = inlined_call_operand.vmem [shape: bf16[1,72,16], index: 1, kind: input, shape index: {}]   ;;  %s860_s2 = inlined_call_operand.vmem [shape: bf16[2,64,16], index: 2, kind: output, shape index: {0}]   ;;  %s861_s3 = inlined_call_operand.vmem [shape: f32[2,1,1,16], index: 3, kind: output, shape index: {1}]   ;;  %s862_s4 = inlined_call_operand.vmem [shape: f32[2,1,1,16], index: 4, kind: output, shape index: {2}]  }
   0x1   :  { %s767_s17 = smov 0  }
   0x2 LB: > { %s27_s18 = sadd.s32 1, %s732_s16  ;;  %p622_p0 = scmp.ge.s32.totalorder %s736_s17, 1  ;;  %s736_s17 = sphi %s767_s17, %s15_s17   ;;  %s732_s16 = sphi %s765_s16, %s864_s16   ;;  %s728_s15 = sphi %s763_s15, %s863_s15  }
   0x3   : > { %p29_p1 = scmp.ge.s32.totalorder %s27_s18, 2  ;;  %p192_p2 = scmp.lt.s32.totalorder %s736_s17, 3 }
   0x5   : > { %s866_s18 = smov (%p29_p1, %s27_s18), 0  ;;  %p193_p3 = pnand %p622_p0, %p192_p2 }
   0x6   : > { %p239_p4 = scmp.lt.s32.totalorder (!%p193_p3), %s728_s15, 1 }
   0x7   : > { %196 = sbr.rel (%p193_p3) target bundleno = 232 (0xe8), region = 28 }
   0xc   : > { %v287_v0 = vld [vmem:[%s859_s1 + $0x20] sm:$0xf]  ;;  %vm348_vm0 = vcmask 1043456   ;;  %v674_v4 = vld [vmem:[%s859_s1 + $0x18] sm:$0xff]  ;;  %v673_v5 = vld [vmem:[%s859_s1 + $0x10] sm:$0xff]  ;;  %s868_s15 = smov (!%p239_p4, %s728_s15), 1 }
   0xd   : > { %v325_v1 = vunpack.c.l.b16 %v287_v0  ;;  %v672_v6 = vld [vmem:[%s859_s1 + $0x8] sm:$0xff]  ;;  %s665_s27 = sshll.u32 %s868_s15, 5  ;;  %v671_v7 = vld [vmem:[%s859_s1] sm:$0xff]  ;;  %vm335_vm1 = vcmask 588800   ;;  %vm389_vm2 = vcmask 125952   ;;  %vm398_vm3 = vcmask 130048   ;;  %s263_s12 = scalar_lea.vmem %s861_s3, %s868_s15 }
   0xe   : > { %s246_s6 = scalar_lea.vmem %s858_s0, %s665_s27  ;;  %s805_s9 = scalar_lea.vmem %s860_s2, %s665_s27  ;;  %vm429_vm4 = vcmask 122880  }
   0xf   : > { %v330_v2 = vpack.c.b16 %v325_v1, %v325_v1  ;;  %v667_v8 = vld [vmem:[%s246_s6] sm:$0xff]  ;;  %v668_v9 = vld [vmem:[%s246_s6 + $0x8] sm:$0xff]  ;;  %v669_v10 = vld [vmem:[%s246_s6 + $0x10] sm:$0xff]  ;;  %s269_s19 = scalar_lea.vmem %s862_s4, %s868_s15 }
  0x10   : > { %v670_v11 = vld [vmem:[%s246_s6 + $0x18] sm:$0xff] }
  0x11   : > { %v350_v3 = vsel %vm348_vm0, %v330_v2, 0 }
  0x12   : > { %355 = vmatpush.bf16.msra.mxu0 %v350_v3  ;;  %675 = vmatpush.bf16.msra.mxu1 %v350_v3 }
  0x13   : > { %676 = vmatpush.bf16.msra.mxu2 %v350_v3  ;;  %677 = vmatpush.bf16.msra.mxu3 %v350_v3 }
  0x16   : > { %356 = vmatpush.bf16.msra.mxu0 %v674_v4  ;;  %678 = vmatpush.bf16.msra.mxu1 %v674_v4 }
  0x17   : > { %679 = vmatpush.bf16.msra.mxu2 %v674_v4  ;;  %680 = vmatpush.bf16.msra.mxu3 %v674_v4 }
  0x1a   : > { %357 = vmatpush.bf16.msra.mxu0 %v673_v5  ;;  %681 = vmatpush.bf16.msra.mxu1 %v673_v5 }
  0x1b   : > { %682 = vmatpush.bf16.msra.mxu2 %v673_v5  ;;  %683 = vmatpush.bf16.msra.mxu3 %v673_v5 }
  0x1e   : > { %358 = vmatpush.bf16.msra.mxu0 %v672_v6  ;;  %684 = vmatpush.bf16.msra.mxu1 %v672_v6 }
  0x1f   : > { %685 = vmatpush.bf16.msra.mxu2 %v672_v6  ;;  %686 = vmatpush.bf16.msra.mxu3 %v672_v6 }
  0x22   : > { %359 = vmatpush.bf16.msra.mxu0 %v671_v7  ;;  %687 = vmatpush.bf16.msra.mxu1 %v671_v7 }
  0x23   : > { %688 = vmatpush.bf16.msra.mxu2 %v671_v7  ;;  %689 = vmatpush.bf16.msra.mxu3 %v671_v7 }
  0x25   : > { %659 = vmatmul.msk.bf16.vlgmr.msra.gmra.mxu0 %vm335_vm1, %v667_v8  ;;  %660 = vmatmul.msk.bf16.vlgmr.msra.gmra.mxu1 %vm335_vm1, %v668_v9 }
  0x26   : > { %661 = vmatmul.msk.bf16.vlgmr.msra.gmra.mxu2 %vm335_vm1, %v669_v10  ;;  %662 = vmatmul.msk.bf16.vlgmr.msra.gmra.mxu3 %vm335_vm1, %v670_v11 }
  0xa2   : > { %v361_v12 = vpop.f32.mrf.mxu0  ;;  %v366_v13 = vpop.f32.mrf.mxu1 }
  0xa3   : > { %v381_v14 = vpack.c.bf16 %v361_v12, %v361_v12  ;;  %v383_v15 = vpack.c.bf16 %v366_v13, %v366_v13  ;;  %v399_v22 = vsel %vm398_vm3, %v361_v12, 0.0  ;;  %v402_v27 = vsel %vm398_vm3, %v366_v13, 0.0 }
  0xa5   : > { %390 = vst.msk [vmem:[%s805_s9] sm:$0xf] %vm389_vm2, %v381_v14 }
  0xa6   : > { %392 = vst.msk [vmem:[%s805_s9 + $0x8] sm:$0xf] %vm389_vm2, %v383_v15 }
  0xa9   : > { %v371_v16 = vpop.f32.mrf.mxu2  ;;  %v376_v17 = vpop.f32.mrf.mxu3 }
  0xaa   : > { %v385_v18 = vpack.c.bf16 %v371_v16, %v371_v16  ;;  %v387_v19 = vpack.c.bf16 %v376_v17, %v376_v17  ;;  %v363_v20 = vpop.f32.mrf.mxu0  ;;  %v368_v21 = vpop.f32.mrf.mxu1  ;;  %v406_v31 = vsel %vm398_vm3, %v371_v16, 0.0  ;;  %v410_v39 = vsel %vm398_vm3, %v376_v17, 0.0 }
  0xab   : > { %v382_v23 = vpack.c.bf16 %v363_v20, %v363_v20  ;;  %v400_v24 = vsel %vm398_vm3, %v363_v20, 0.0  ;;  %v384_v25 = vpack.c.bf16 %v368_v21, %v368_v21  ;;  %v404_v29 = vsel %vm398_vm3, %v368_v21, 0.0 }
  0xac   : > { %394 = vst.msk [vmem:[%s805_s9 + $0x10] sm:$0xf] %vm389_vm2, %v385_v18  ;;  %v401_v26 = vadd.f32 %v400_v24, %v399_v22 }
  0xad   : > { %396 = vst.msk [vmem:[%s805_s9 + $0x18] sm:$0xf] %vm389_vm2, %v387_v19 }
  0xae   : > { %391 = vst.msk [vmem:[%s805_s9 + $0x4] sm:$0xf] %vm389_vm2, %v382_v23  ;;  %v403_v28 = vadd.f32 %v402_v27, %v401_v26 }
  0xaf   : > { %393 = vst.msk [vmem:[%s805_s9 + $0xc] sm:$0xf] %vm389_vm2, %v384_v25 }
  0xb0   : > { %v405_v30 = vadd.f32 %v404_v29, %v403_v28 }
  0xb1   : > { %v373_v32 = vpop.f32.mrf.mxu2  ;;  %v378_v33 = vpop.f32.mrf.mxu3 }
  0xb2   : > { %v386_v34 = vpack.c.bf16 %v373_v32, %v373_v32  ;;  %v407_v35 = vadd.f32 %v406_v31, %v405_v30  ;;  %v388_v36 = vpack.c.bf16 %v378_v33, %v378_v33  ;;  %v408_v37 = vsel %vm398_vm3, %v373_v32, 0.0 }
  0xb3   : > { %v412_v41 = vsel %vm398_vm3, %v378_v33, 0.0 }
  0xb4   : > { %395 = vst.msk [vmem:[%s805_s9 + $0x14] sm:$0xf] %vm389_vm2, %v386_v34  ;;  %v409_v38 = vadd.f32 %v408_v37, %v407_v35 }
  0xb5   : > { %397 = vst.msk [vmem:[%s805_s9 + $0x1c] sm:$0xf] %vm389_vm2, %v388_v36 }
  0xb6   : > { %v411_v40 = vadd.f32 %v410_v39, %v409_v38 }
  0xb8   : > { %v413_v42 = vadd.f32 %v412_v41, %v411_v40 }
  0xba   : > { %v414_v43 = vrot.slane %v413_v42, 4 }
  0xbc   : > { %v415_v44 = vadd.f32 %v414_v43, %v413_v42 }
  0xbe   : > { %v416_v45 = vrot.slane %v415_v44, 2 }
  0xc0   : > { %v417_v46 = vadd.f32 %v416_v45, %v415_v44 }
  0xc2   : > { %v418_v47 = vrot.slane %v417_v46, 1 }
  0xc4   : > { %v419_v48 = vadd.f32 %v418_v47, %v417_v46 }
  0xc6   : > { %v420_v49 = vmul.f32 0.015625, %v419_v48  ;;  %430 = vst.msk [vmem:[%s263_s12] sm:$0x1] %vm429_vm4, %v419_v48 }
  0xc8   : > { %v421_v50 = vsub.f32 %v361_v12, %v420_v49  ;;  %v422_v51 = vsub.f32 %v363_v20, %v420_v49  ;;  %v423_v52 = vsub.f32 %v366_v13, %v420_v49  ;;  %v424_v53 = vsub.f32 %v368_v21, %v420_v49 }
  0xc9   : > { %v425_v54 = vsub.f32 %v371_v16, %v420_v49  ;;  %v426_v58 = vsub.f32 %v373_v32, %v420_v49  ;;  %v427_v63 = vsub.f32 %v376_v17, %v420_v49  ;;  %v428_v3 = vsub.f32 %v378_v33, %v420_v49 }
  0xca   : > { %v431_v55 = vmul.f32 %v421_v50, %v421_v50  ;;  %v432_v56 = vmul.f32 %v422_v51, %v422_v51  ;;  %v433_v57 = vmul.f32 %v423_v52, %v423_v52  ;;  %v434_v59 = vmul.f32 %v424_v53, %v424_v53 }
  0xcb   : > { %v435_v0 = vmul.f32 %v425_v54, %v425_v54  ;;  %v436_v4 = vmul.f32 %v426_v58, %v426_v58  ;;  %v437_v7 = vmul.f32 %v427_v63, %v427_v63  ;;  %v438_v10 = vmul.f32 %v428_v3, %v428_v3 }
  0xcc   : > { %v439_v60 = vsel %vm398_vm3, %v431_v55, 0.0  ;;  %v440_v61 = vsel %vm398_vm3, %v432_v56, 0.0  ;;  %v442_v1 = vsel %vm398_vm3, %v433_v57, 0.0  ;;  %v444_v5 = vsel %vm398_vm3, %v434_v59, 0.0 }
  0xcd   : > { %v441_v62 = vadd.f32 %v440_v61, %v439_v60  ;;  %v446_v8 = vsel %vm398_vm3, %v435_v0, 0.0  ;;  %v448_v11 = vsel %vm398_vm3, %v436_v4, 0.0  ;;  %v450_v13 = vsel %vm398_vm3, %v437_v7, 0.0 }
  0xce   : > { %v452_v15 = vsel %vm398_vm3, %v438_v10, 0.0 }
  0xcf   : > { %v443_v2 = vadd.f32 %v442_v1, %v441_v62 }
  0xd1   : > { %v445_v6 = vadd.f32 %v444_v5, %v443_v2 }
  0xd3   : > { %v447_v9 = vadd.f32 %v446_v8, %v445_v6 }
  0xd5   : > { %v449_v12 = vadd.f32 %v448_v11, %v447_v9 }
  0xd7   : > { %v451_v14 = vadd.f32 %v450_v13, %v449_v12 }
  0xd9   : > { %v453_v16 = vadd.f32 %v452_v15, %v451_v14 }
  0xdb   : > { %v454_v17 = vrot.slane %v453_v16, 4 }
  0xdd   : > { %v455_v18 = vadd.f32 %v454_v17, %v453_v16 }
  0xdf   : > { %v456_v19 = vrot.slane %v455_v18, 2 }
  0xe1   : > { %v457_v20 = vadd.f32 %v456_v19, %v455_v18 }
  0xe3   : > { %v458_v21 = vrot.slane %v457_v20, 1 }
  0xe5   : > { %v459_v22 = vadd.f32 %v458_v21, %v457_v20 }
  0xe7   : > { %460 = vst.msk [vmem:[%s269_s19] sm:$0x1] %vm429_vm4, %v459_v22 }
  0xe8 PF: > { %s15_s17 = sadd.s32 1, %s736_s17   ;;  %s863_s15 = smov %s732_s16 }
  0xe9   : > { %p12_p5 = scmp.ge.s32.totalorder %s15_s17, 4   ;;  %s864_s16 = smov %s866_s18 }
  0xeb   :  { %14 = sbr.rel (!%p12_p5) target bundleno = 2 (0x2), region = 82 }

// kernel: conv_stem_forward.11
= control target key start
LH: loop header
LB: loop body
LE: loop exit
PB: predicated region body
PF: predicated region fallthrough
CT: control target
= control target key end

     0   :  { %s83_s0 = inlined_call_operand.vmem [shape: bf16[16,128], index: 0, kind: input, shape index: {}]   ;;  %s84_s1 = inlined_call_operand.vmem [shape: f32[1,128], index: 1, kind: input, shape index: {}]   ;;  %s85_s2 = inlined_call_operand.vmem [shape: f32[1,128], index: 2, kind: input, shape index: {}]   ;;  %s86_s3 = inlined_call_operand.vmem [shape: bf16[16,128], index: 3, kind: output, shape index: {}]  }
   0x1   :  { %v41_v0 = vld [vmem:[%s83_s0] sm:$0xff]  }
   0x2   :  { %v49_v1 = vld [vmem:[%s84_s1] ss:$0 sm:$0xff]  ;;  %v42_v2 = vunpack.c.l.bf16 %v41_v0  ;;  %v43_v3 = vunpack.c.h.bf16 %v41_v0 }
   0x3   :  { %v50_v4 = vld [vmem:[%s85_s2] ss:$0 sm:$0xff] }
   0x4   :  { %v22_v5 = vmul.f32 %v49_v1, %v42_v2  ;;  %v23_v6 = vmul.f32 %v49_v1, %v43_v3 }
   0x6   :  { %v28_v7 = vadd.f32 %v50_v4, %v22_v5  ;;  %v29_v8 = vadd.f32 %v50_v4, %v23_v6 }
   0x8   :  { %v30_v9 = vmax.f32 %v28_v7, 0.0  ;;  %v31_v10 = vmax.f32 %v29_v8, 0.0 }
   0xa   :  { %v47_v11 = vpack.c.bf16 %v31_v10, %v30_v9 }
   0xc   :  { %48 = vst [vmem:[%s86_s3] sm:$0xff] %v47_v11  }

// kernel: tile.53
= control target key start
LH: loop header
LB: loop body
LE: loop exit
PB: predicated region body
PF: predicated region fallthrough
CT: control target
= control target key end

     0   :  { %s22_s0 = inlined_call_operand.vmem [shape: f32[32], index: 0, kind: input, shape index: {}]   ;;  %s23_s1 = inlined_call_operand.vmem [shape: f32[4,32], index: 1, kind: output, shape index: {}]  }
   0x1   :  { %v4_v0 = vld [vmem:[%s22_s0] ss:$0 sm:$0xff] }
   0x2   :  { %5 = vst [vmem:[%s23_s1] sm:$0xf] %v4_v0 }

// kernel: tile.54
= control target key start
LH: loop header
LB: loop body
LE: loop exit
PB: predicated region body
PF: predicated region fallthrough
CT: control target
= control target key end

     0   :  { %s37_s8 = smov 32   ;;  %s38_s9 = smov 64   ;;  %vm7_vm0 = vcmask 261120   ;;  %vm13_vm1 = vcmask 1048320   ;;  %vm19_vm2 = vcmask 785920   ;;  %vm25_vm3 = vcmask 523520   ;;  %s55_s0 = inlined_call_operand.vmem [shape: f32[4,32], index: 0, kind: input, shape index: {}]   ;;  %s56_s1 = inlined_call_operand.vmem [shape: f32[1,128], index: 1, kind: output, shape index: {}]  }
   0x1   :  { %v4_v0 = vld [vmem:[%s55_s0] sm:$0xf]  ;;  %s36_s0 = smov 96  }
   0x2   :  { %5 = vst [vmem:[#allocation1] sm:$0xf] %v4_v0 }
   0x9   :  { %v10_v1 = vld [vmem:[#allocation1 + $0x3] sm:$0x1]   ;;  %v22_v2 = vld [vmem:[#allocation1 + $0x1] sm:$0x1]   ;;  %v16_v3 = vld [vmem:[#allocation1 + $0x2] sm:$0x1]  }
   0xa   :  { %11 = vrot.lane.b32.xlu0 %v10_v1, %s36_s0  ;;  %23 = vrot.lane.b32.xlu1 %v22_v2, %s37_s8  ;;  %v6_v4 = vld [vmem:[#allocation1] sm:$0x1]  }
   0xb   :  { %8 = vst.msk [vmem:[#allocation0] sm:$0x1] %vm7_vm0, %v6_v4  }
  0x12   :  { %17 = vrot.lane.b32.xlu0 %v16_v3, %s38_s9 }
  0x7c   :  { %v12_v5 = vpop.permute.xlu0 %11   ;;  %v24_v6 = vpop.permute.xlu1 %23  }
  0x7d   :  { %14 = vst.msk [vmem:[#allocation0] sm:$0x1] %vm13_vm1, %v12_v5  }
  0x84   :  { %v18_v7 = vpop.permute.xlu0 %17  }
  0x85   :  { %20 = vst.msk [vmem:[#allocation0] sm:$0x1] %vm19_vm2, %v18_v7  }
  0x86   :  { %26 = vst.msk [vmem:[#allocation0] sm:$0x1] %vm25_vm3, %v24_v6  }
  0x8d   :  { %v29_v8 = vld [vmem:[#allocation0] sm:$0x1] }
  0x8e   :  { %32 = vst [vmem:[%s56_s1] sm:$0x1] %v29_v8 }

// kernel: conv_stem_forward.12
= control target key start
LH: loop header
LB: loop body
LE: loop exit
PB: predicated region body
PF: predicated region fallthrough
CT: control target
= control target key end

     0   :  { %s775_s15 = smov 0   ;;  %s777_s16 = smov 0   ;;  %s853_s0 = inlined_call_operand.vmem [shape: bf16[2,3,16,48], index: 0, kind: input, shape index: {}]   ;;  %s854_s1 = inlined_call_operand.vmem [shape: bf16[3,48,32], index: 1, kind: input, shape index: {}]   ;;  %s855_s2 = inlined_call_operand.vmem [shape: bf16[2,16,32], index: 2, kind: output, shape index: {0}]   ;;  %s856_s3 = inlined_call_operand.vmem [shape: f32[2,1,1,32], index: 3, kind: output, shape index: {1}]   ;;  %s857_s4 = inlined_call_operand.vmem [shape: f32[2,1,1,32], index: 4, kind: output, shape index: {2}]  }
   0x1   :  { %s779_s17 = smov 0  }
   0x2 LB: > { %s27_s18 = sadd.s32 1, %s744_s16  ;;  %p615_p0 = scmp.ge.s32.totalorder %s748_s17, 1  ;;  %s748_s17 = sphi %s779_s17, %s15_s17   ;;  %s744_s16 = sphi %s777_s16, %s859_s16   ;;  %s740_s15 = sphi %s775_s15, %s858_s15  }
   0x3   : > { %p29_p1 = scmp.ge.s32.totalorder %s27_s18, 2  ;;  %p192_p2 = scmp.lt.s32.totalorder %s748_s17, 3 }
   0x5   : > { %s861_s18 = smov (%p29_p1, %s27_s18), 0  ;;  %p193_p3 = pnand %p615_p0, %p192_p2 }
   0x6   : > { %p239_p4 = scmp.lt.s32.totalorder (!%p193_p3), %s740_s15, 1 }
   0x7   : > { %196 = sbr.rel (%p193_p3) target bundleno = 204 (0xcc), region = 28 }
   0xc   : > { %v696_v0 = vld [vmem:[%s854_s1 + $0x28] sm:$0xff]  ;;  %v692_v1 = vld [vmem:[%s854_s1 + $0x10] sm:$0xff]  ;;  %v700_v2 = vld [vmem:[%s854_s1 + $0x40] sm:$0xff]  ;;  %s863_s15 = smov (!%p239_p4, %s740_s15), 1  ;;  %vm312_vm0 = vcmask 392192   ;;  %vm424_vm1 = vcmask 257024  }
   0xd   : > { %321 = vmatpush.bf16.msra.mxu0 %v696_v0  ;;  %361 = vmatpush.bf16.msra.mxu1 %v692_v1  ;;  %v695_v3 = vld [vmem:[%s854_s1 + $0x20] sm:$0xff]  ;;  %v691_v4 = vld [vmem:[%s854_s1 + $0x8] sm:$0xff]  ;;  %v699_v5 = vld [vmem:[%s854_s1 + $0x38] sm:$0xff]  ;;  %s701_s5 = smul.u32 24, %s863_s15  ;;  %s688_s19 = sshll.u32 %s863_s15, 3  ;;  %vm427_vm2 = vcmask 261120  }
   0xe   : > { %411 = vmatpush.bf16.msra.mxu2 %v700_v2  ;;  %v694_v6 = vld [vmem:[%s854_s1 + $0x18] sm:$0xff]  ;;  %v690_v7 = vld [vmem:[%s854_s1] sm:$0xff]  ;;  %v698_v8 = vld [vmem:[%s854_s1 + $0x30] sm:$0xff]  ;;  %s256_s22 = scalar_lea.vmem %s855_s2, %s688_s19  ;;  %s263_s25 = scalar_lea.vmem %s856_s3, %s863_s15  ;;  %vm440_vm3 = vcmask 253952  }
   0xf   : > { %s246_s12 = scalar_lea.vmem %s853_s0, %s701_s5  ;;  %s269_s28 = scalar_lea.vmem %s857_s4, %s863_s15 }
  0x10   : > { %v693_v9 = vld [vmem:[%s246_s12 + $0x8] sm:$0xff]  ;;  %v689_v10 = vld [vmem:[%s246_s12] sm:$0xff]  ;;  %v697_v11 = vld [vmem:[%s246_s12 + $0x10] sm:$0xff] }
  0x11   : > { %322 = vmatpush.bf16.msra.mxu0 %v695_v3  ;;  %362 = vmatpush.bf16.msra.mxu1 %v691_v4 }
  0x12   : > { %412 = vmatpush.bf16.msra.mxu2 %v699_v5 }
  0x15   : > { %323 = vmatpush.bf16.msra.mxu0 %v694_v6  ;;  %363 = vmatpush.bf16.msra.mxu1 %v690_v7 }
  0x16   : > { %413 = vmatpush.bf16.msra.mxu2 %v698_v8 }
  0x18   : > { %643 = vmatmul.msk.bf16.vlgmr.msra.gmra.mxu0 %vm312_vm0, %v693_v9  ;;  %660 = vmatmul.msk.bf16.vlgmr.msra.gmra.mxu1 %vm312_vm0, %v689_v10 }
  0x19   : > { %685 = vmatmul.msk.bf16.vlgmr.msra.gmra.mxu2 %vm312_vm0, %v697_v11 }
  0x95   : > { %v325_v12 = vpop.f32.mrf.mxu0  ;;  %v365_v13 = vpop.f32.mrf.mxu1 }
  0x96   : > { %v366_v14 = vadd.f32 %v365_v13, %v325_v12 }
  0x9c   : > { %v415_v15 = vpop.f32.mrf.mxu2 }
  0x9d   : > { %v420_v16 = vadd.f32 %v415_v15, %v366_v14  ;;  %v327_v18 = vpop.f32.mrf.mxu0  ;;  %v367_v19 = vpop.f32.mrf.mxu1 }
  0x9e   : > { %v368_v20 = vadd.f32 %v367_v19, %v327_v18 }
  0x9f   : > { %v422_v17 = vpack.c.bf16 %v420_v16, %v420_v16  ;;  %v428_v23 = vsel %vm427_vm2, %v420_v16, 0.0 }
  0xa1   : > { %425 = vst.msk [vmem:[%s256_s22] sm:$0xf] %vm424_vm1, %v422_v17 }
  0xa4   : > { %v417_v21 = vpop.f32.mrf.mxu2 }
  0xa5   : > { %v421_v22 = vadd.f32 %v417_v21, %v368_v20 }
  0xa7   : > { %v423_v24 = vpack.c.bf16 %v421_v22, %v421_v22  ;;  %v429_v25 = vsel %vm427_vm2, %v421_v22, 0.0 }
  0xa8   : > { %v430_v26 = vadd.f32 %v429_v25, %v428_v23 }
  0xa9   : > { %426 = vst.msk [vmem:[%s256_s22 + $0x4] sm:$0xf] %vm424_vm1, %v423_v24 }
  0xaa   : > { %v431_v27 = vrot.slane %v430_v26, 4 }
  0xac   : > { %v432_v28 = vadd.f32 %v431_v27, %v430_v26 }
  0xae   : > { %v433_v29 = vrot.slane %v432_v28, 2 }
  0xb0   : > { %v434_v30 = vadd.f32 %v433_v29, %v432_v28 }
  0xb2   : > { %v435_v31 = vrot.slane %v434_v30, 1 }
  0xb4   : > { %v436_v32 = vadd.f32 %v435_v31, %v434_v30 }
  0xb6   : > { %v437_v33 = vmul.f32 0.0625, %v436_v32  ;;  %441 = vst.msk [vmem:[%s263_s25] sm:$0x1] %vm440_vm3, %v436_v32 }
  0xb8   : > { %v438_v34 = vsub.f32 %v420_v16, %v437_v33  ;;  %v439_v35 = vsub.f32 %v421_v22, %v437_v33 }
  0xba   : > { %v442_v36 = vmul.f32 %v438_v34, %v438_v34  ;;  %v443_v37 = vmul.f32 %v439_v35, %v439_v35 }
  0xbc   : > { %v444_v38 = vsel %vm427_vm2, %v442_v36, 0.0  ;;  %v445_v39 = vsel %vm427_vm2, %v443_v37, 0.0 }
  0xbd   : > { %v446_v40 = vadd.f32 %v445_v39, %v444_v38 }
  0xbf   : > { %v447_v41 = vrot.slane %v446_v40, 4 }
  0xc1   : > { %v448_v42 = vadd.f32 %v447_v41, %v446_v40 }
  0xc3   : > { %v449_v43 = vrot.slane %v448_v42, 2 }
  0xc5   : > { %v450_v44 = vadd.f32 %v449_v43, %v448_v42 }
  0xc7   : > { %v451_v45 = vrot.slane %v450_v44, 1 }
  0xc9   : > { %v452_v46 = vadd.f32 %v451_v45, %v450_v44 }
  0xcb   : > { %453 = vst.msk [vmem:[%s269_s28] sm:$0x1] %vm440_vm3, %v452_v46 }
  0xcc PF: > { %s15_s17 = sadd.s32 1, %s748_s17   ;;  %s858_s15 = smov %s744_s16 }
  0xcd   : > { %p12_p5 = scmp.ge.s32.totalorder %s15_s17, 4   ;;  %s859_s16 = smov %s861_s18 }
  0xcf   :  { %14 = sbr.rel (!%p12_p5) target bundleno = 2 (0x2), region = 86 }

// kernel: conv_stem_forward.13
= control target key start
LH: loop header
LB: loop body
LE: loop exit
PB: predicated region body
PF: predicated region fallthrough
CT: control target
= control target key end

     0   :  { %s67_s0 = inlined_call_operand.vmem [shape: bf16[8,128], index: 0, kind: input, shape index: {}]   ;;  %s68_s1 = inlined_call_operand.vmem [shape: f32[1,128], index: 1, kind: input, shape index: {}]   ;;  %s69_s2 = inlined_call_operand.vmem [shape: f32[1,128], index: 2, kind: input, shape index: {}]   ;;  %s70_s3 = inlined_call_operand.vmem [shape: bf16[8,128], index: 3, kind: output, shape index: {}]  }
   0x1   :  { %v14_v0 = vld [vmem:[%s67_s0] sm:$0xf] }
   0x2   :  { %v33_v1 = vld [vmem:[%s68_s1] ss:$0 sm:$0xff]  ;;  %v15_v2 = vunpack.c.l.bf16 %v14_v0 }
   0x3   :  { %v34_v3 = vld [vmem:[%s69_s2] ss:$0 sm:$0xff] }
   0x4   :  { %v20_v4 = vmul.f32 %v33_v1, %v15_v2 }
   0x6   :  { %v25_v5 = vadd.f32 %v34_v3, %v20_v4 }
   0x8   :  { %v26_v6 = vmax.f32 %v25_v5, 0.0 }
   0xa   :  { %v27_v7 = vpack.c.bf16 %v26_v6, %v26_v6 }
   0xc   :  { %28 = vst [vmem:[%s70_s3] sm:$0xf] %v27_v7 }

// kernel: conv_stem_forward.14
= control target key start
LH: loop header
LB: loop body
LE: loop exit
PB: predicated region body
PF: predicated region fallthrough
CT: control target
= control target key end

     0   :  { %s835_s15 = smov 0   ;;  %s837_s16 = smov 0   ;;  %s940_s0 = inlined_call_operand.vmem [shape: bf16[2,3,4,96], index: 0, kind: input, shape index: {}]   ;;  %s941_s1 = inlined_call_operand.vmem [shape: bf16[3,96,64], index: 1, kind: input, shape index: {}]   ;;  %s942_s2 = inlined_call_operand.vmem [shape: bf16[2,4,64], index: 2, kind: output, shape index: {0}]   ;;  %s943_s3 = inlined_call_operand.vmem [shape: f32[2,1,1,64], index: 3, kind: output, shape index: {1}]   ;;  %s944_s4 = inlined_call_operand.vmem [shape: f32[2,1,1,64], index: 4, kind: output, shape index: {2}]  }
   0x1   :  { %s839_s17 = smov 0  }
   0x2 LB: > { %s27_s18 = sadd.s32 1, %s804_s16  ;;  %p637_p0 = scmp.ge.s32.totalorder %s808_s17, 1  ;;  %s808_s17 = sphi %s839_s17, %s15_s17   ;;  %s804_s16 = sphi %s837_s16, %s946_s16   ;;  %s800_s15 = sphi %s835_s15, %s945_s15  }
   0x3   : > { %p29_p1 = scmp.ge.s32.totalorder %s27_s18, 2  ;;  %p190_p2 = scmp.lt.s32.totalorder %s808_s17, 3 }
   0x5   : > { %s948_s18 = smov (%p29_p1, %s27_s18), 0  ;;  %p191_p3 = pnand %p637_p0, %p190_p2 }
   0x6   : > { %p233_p4 = scmp.lt.s32.totalorder (!%p191_p3), %s800_s15, 1 }
   0x7   : > { %194 = sbr.rel (%p191_p3) target bundleno = 204 (0xcc), region = 28 }
   0xc   : > { %v754_v0 = vld [vmem:[%s941_s1 + $0x58] sm:$0xff]  ;;  %v748_v1 = vld [vmem:[%s941_s1 + $0x28] sm:$0xff]  ;;  %v753_v3 = vld [vmem:[%s941_s1 + $0x50] sm:$0xff]  ;;  %s950_s15 = smov (!%p233_p4, %s800_s15), 1  ;;  %vm325_vm0 = vcmask 785408   ;;  %vm465_vm1 = vcmask 519168  }
   0xd   : > { %v760_v2 = vld [vmem:[%s941_s1 + $0x88] sm:$0xff]  ;;  %331 = vmatpush.bf16.msra.mxu0 %v754_v0  ;;  %383 = vmatpush.bf16.msra.mxu1 %v748_v1  ;;  %v747_v4 = vld [vmem:[%s941_s1 + $0x20] sm:$0xff]  ;;  %v746_v7 = vld [vmem:[%s941_s1 + $0x18] sm:$0xff]  ;;  %s761_s27 = smul.u32 6, %s950_s15  ;;  %s639_s11 = sshll.u32 %s950_s15, 1  ;;  %vm463_vm2 = vcmask 517120  }
   0xe   : > { %450 = vmatpush.bf16.msra.mxu2 %v760_v2  ;;  %v759_v5 = vld [vmem:[%s941_s1 + $0x80] sm:$0xff]  ;;  %v752_v6 = vld [vmem:[%s941_s1 + $0x48] sm:$0xff]  ;;  %v758_v8 = vld [vmem:[%s941_s1 + $0x78] sm:$0xff]  ;;  %s247_s14 = scalar_lea.vmem %s942_s2, %s639_s11  ;;  %s253_s21 = scalar_lea.vmem %s943_s3, %s950_s15  ;;  %vm475_vm3 = vcmask 516096  }
   0xf   : > { %v751_v9 = vld [vmem:[%s941_s1 + $0x40] sm:$0xff]  ;;  %v745_v10 = vld [vmem:[%s941_s1 + $0x10] sm:$0xff]  ;;  %v750_v12 = vld [vmem:[%s941_s1 + $0x38] sm:$0xff]  ;;  %s240_s10 = scalar_lea.vmem %s940_s0, %s761_s27  ;;  %s259_s24 = scalar_lea.vmem %s944_s4, %s950_s15 }
  0x10   : > { %v757_v11 = vld [vmem:[%s941_s1 + $0x70] sm:$0xff]  ;;  %v744_v13 = vld [vmem:[%s941_s1 + $0x8] sm:$0xff]  ;;  %v743_v16 = vld [vmem:[%s941_s1] sm:$0xff] }
  0x11   : > { %332 = vmatpush.bf16.msra.mxu0 %v753_v3  ;;  %384 = vmatpush.bf16.msra.mxu1 %v747_v4  ;;  %v756_v14 = vld [vmem:[%s941_s1 + $0x68] sm:$0xff]  ;;  %v749_v15 = vld [vmem:[%s941_s1 + $0x30] sm:$0xff]  ;;  %v755_v17 = vld [vmem:[%s941_s1 + $0x60] sm:$0xff] }
  0x12   : > { %451 = vmatpush.bf16.msra.mxu2 %v759_v5  ;;  %v640_v18 = vld [vmem:[%s240_s10 + $0x2] sm:$0x3]  ;;  %v261_v19 = vld [vmem:[%s240_s10] sm:$0x3]  ;;  %v703_v20 = vld [vmem:[%s240_s10 + $0x4] sm:$0x3] }
  0x15   : > { %333 = vmatpush.bf16.msra.mxu0 %v752_v6  ;;  %385 = vmatpush.bf16.msra.mxu1 %v746_v7 }
  0x16   : > { %452 = vmatpush.bf16.msra.mxu2 %v758_v8 }
  0x19   : > { %334 = vmatpush.bf16.msra.mxu0 %v751_v9  ;;  %386 = vmatpush.bf16.msra.mxu1 %v745_v10 }
  0x1a   : > { %453 = vmatpush.bf16.msra.mxu2 %v757_v11 }
  0x1d   : > { %335 = vmatpush.bf16.msra.mxu0 %v750_v12  ;;  %387 = vmatpush.bf16.msra.mxu1 %v744_v13 }
  0x1e   : > { %454 = vmatpush.bf16.msra.mxu2 %v756_v14 }
  0x21   : > { %336 = vmatpush.bf16.msra.mxu0 %v749_v15  ;;  %388 = vmatpush.bf16.msra.mxu1 %v743_v16 }
  0x22   : > { %455 = vmatpush.bf16.msra.mxu2 %v755_v17 }
  0x24   : > { %677 = vmatmul.msk.bf16.vlgmr.msra.gmra.mxu0 %vm325_vm0, %v640_v18  ;;  %702 = vmatmul.msk.bf16.vlgmr.msra.gmra.mxu1 %vm325_vm0, %v261_v19 }
  0x25   : > { %740 = vmatmul.msk.bf16.vlgmr.msra.gmra.mxu2 %vm325_vm0, %v703_v20 }
  0xa1   : > { %v338_v21 = vpop.f32.mrf.mxu0  ;;  %v390_v22 = vpop.f32.mrf.mxu1 }
  0xa2   : > { %v391_v23 = vadd.f32 %v390_v22, %v338_v21 }
  0xa8   : > { %v457_v24 = vpop.f32.mrf.mxu2 }
  0xa9   : > { %v461_v25 = vadd.f32 %v457_v24, %v391_v23  ;;  %v340_v26 = vpop.f32.mrf.mxu0  ;;  %v392_v27 = vpop.f32.mrf.mxu1 }
  0xab   : > { %v462_v28 = vpack.c.bf16 %v461_v25, %v461_v25  ;;  %v466_v29 = vsel %vm465_vm1, %v461_v25, 0.0 }
  0xac   : > { %v467_v30 = vrot.slane %v466_v29, 4 }
  0xad   : > { %464 = vst.msk [vmem:[%s247_s14] sm:$0x3] %vm463_vm2, %v462_v28 }
  0xae   : > { %v468_v31 = vadd.f32 %v467_v30, %v466_v29 }
  0xb0   : > { %v469_v32 = vrot.slane %v468_v31, 2  ;;  %v459_v33 = vpop.f32.mrf.mxu2 }
  0xb2   : > { %v470_v34 = vadd.f32 %v469_v32, %v468_v31 }
  0xb4   : > { %v471_v35 = vrot.slane %v470_v34, 1 }
  0xb6   : > { %v472_v36 = vadd.f32 %v471_v35, %v470_v34 }
  0xb8   : > { %v473_v37 = vmul.f32 0.25, %v472_v36  ;;  %476 = vst.msk [vmem:[%s253_s21] sm:$0x1] %vm475_vm3, %v472_v36 }
  0xba   : > { %v474_v38 = vsub.f32 %v461_v25, %v473_v37 }
  0xbc   : > { %v477_v39 = vmul.f32 %v474_v38, %v474_v38 }
  0xbe   : > { %v478_v40 = vsel %vm465_vm1, %v477_v39, 0.0 }
  0xbf   : > { %v479_v41 = vrot.slane %v478_v40, 4 }
  0xc1   : > { %v480_v42 = vadd.f32 %v479_v41, %v478_v40 }
  0xc3   : > { %v481_v43 = vrot.slane %v480_v42, 2 }
  0xc5   : > { %v482_v44 = vadd.f32 %v481_v43, %v480_v42 }
  0xc7   : > { %v483_v45 = vrot.slane %v482_v44, 1 }
  0xc9   : > { %v484_v46 = vadd.f32 %v483_v45, %v482_v44 }
  0xcb   : > { %485 = vst.msk [vmem:[%s259_s24] sm:$0x1] %vm475_vm3, %v484_v46 }
  0xcc PF: > { %s15_s17 = sadd.s32 1, %s808_s17   ;;  %s945_s15 = smov %s804_s16 }
  0xcd   : > { %p12_p5 = scmp.ge.s32.totalorder %s15_s17, 4   ;;  %s946_s16 = smov %s948_s18 }
  0xcf   :  { %14 = sbr.rel (!%p12_p5) target bundleno = 2 (0x2), region = 86 }

// kernel: conv_stem_forward.15
= control target key start
LH: loop header
LB: loop body
LE: loop exit
PB: predicated region body
PF: predicated region fallthrough
CT: control target
= control target key end

     0   :  { %vm26_vm0 = vcmask 523264   ;;  %v172_v2 = vmov 0.0   ;;  %s235_s0 = inlined_call_operand.vmem [shape: bf16[8,64], index: 0, kind: input, shape index: {}]   ;;  %s236_s1 = inlined_call_operand.vmem [shape: f32[1,64], index: 1, kind: input, shape index: {}]   ;;  %s237_s2 = inlined_call_operand.vmem [shape: f32[1,64], index: 2, kind: input, shape index: {}]   ;;  %s238_s3 = inlined_call_operand.vmem [shape: bf16[64,64], index: 3, kind: input, shape index: {}]   ;;  %s239_s4 = inlined_call_operand.vmem [shape: f32[1,64], index: 4, kind: input, shape index: {}]   ;;  %s240_s5 = inlined_call_operand.hbm [shape: f32[8,64], index: 5, kind: output, shape index: {}]  }
   0x1   :  { %v140_v0 = vld [vmem:[%s238_s3 + $0x18] sm:$0xff]  ;;  %v139_v1 = vld [vmem:[%s238_s3 + $0x10] sm:$0xff]  ;;  %27 = vst.msk [vmem:[#allocation2] sm:$0xff] %vm26_vm0, %v172_v2  ;;  %v28_v3 = vld [vmem:[%s235_s0] sm:$0xf] }
   0x2   :  { %83 = vmatpush.bf16.msra.mxu0 %v140_v0  ;;  %v29_v4 = vunpack.c.l.bf16 %v28_v3  ;;  %v143_v5 = vld [vmem:[%s236_s1] ss:$0 sm:$0xff] }
   0x3   :  { %v144_v6 = vld [vmem:[%s237_s2] ss:$0 sm:$0xff] }
   0x4   :  { %10 = vsyncpa [#allocation4], 0  ;;  %v34_v7 = vmul.f32 %v143_v5, %v29_v4  ;;  %v138_v8 = vld [vmem:[%s238_s3 + $0x8] sm:$0xff]  ;;  %v137_v11 = vld [vmem:[%s238_s3] sm:$0xff]  ;;  %s173_s6 = smov [#allocation3]   ;;  %s111_s3 = sshll.u32 %s240_s5, 4  ;;  %s112_s3 = int_to_ptr.hbm [resolvable:$true] %s111_s3 }
   0x5   :  { %v145_v16 = vld [vmem:[%s239_s4] ss:$0 sm:$0xff]  ;;  %s109_s7 = sshll.u32 %s173_s6, 4  ;;  %s110_s7 = int_to_ptr.vmem [resolvable:$true] %s109_s7 }
   0x6   :  { %84 = vmatpush.bf16.msra.mxu0 %v139_v1  ;;  %v39_v9 = vadd.f32 %v144_v6, %v34_v7 }
   0x8   :  { %v40_v10 = vmax.f32 %v39_v9, 0.0  ;;  %v42_v13 = vld [vmem:[#allocation2] sm:$0xff] }
   0xa   :  { %85 = vmatpush.bf16.msra.mxu0 %v138_v8  ;;  %v41_v12 = vpack.c.bf16 %v40_v10, %v40_v10 }
   0xe   :  { %86 = vmatpush.bf16.msra.mxu0 %v137_v11 }
  0x11   :  { %136 = vmatmul.msk.bf16.vlgmr.msra.gmra.mxu0 %vm26_vm0, %v41_v12 }
  0x8e   :  { %v88_v14 = vpop.f32.mrf.mxu0 }
  0x8f   :  { %v92_v15 = vadd.f32 %v88_v14, %v42_v13 }
  0x91   :  { %93 = vst.msk [vmem:[#allocation2] sm:$0xff] %vm26_vm0, %v92_v15 }
  0x96   :  { %v90_v17 = vpop.f32.mrf.mxu0 }
  0x98   :  { %v97_v18 = vld [vmem:[#allocation2] sm:$0xff] }
  0x99   :  { %v102_v19 = vadd.f32 %v145_v16, %v97_v18 }
  0x9b   :  { %103 = vst.msk [vmem:[#allocation3] sm:$0xff] %vm26_vm0, %v102_v19 }
  0x9c   :  { %114 = dma.vmem_to_hbm [thread:$0]  %s110_s7, 128, %s112_s3, [#allocation4]  }
  0x9d   :  { %170 = dma.done.wait [#allocation4], 128  }
  0x9e   :  { %171 = vsyncadd [#allocation4], 4294967168 }
  0x9f   :  { %119 = vsyncpa [#allocation4], 1 }

</bundles_post_ra>
